<compile_context>
chip_gen: v7x
topology: tpu7x:2x2x1
jax: 0.10.0
libtpu: 0.0.40
codegen_flags: <defaults>
</compile_context>

<pallas_src>
import functools

import jax
import jax.numpy as jnp
from jax import lax
from jax.experimental import pallas as pl
from jax.experimental.pallas import tpu as pltpu


def _round_up(x, m):
    return ((x + m - 1) // m) * m


# ---------------------------------------------------------------------------
# Fused multi-layer RNN + FC kernel
# ---------------------------------------------------------------------------
def _make_fused_kernel(*, layer_dim, seq_len, chunk, b_pad, n_chunks, unroll):
    """Build the fused kernel for a static layer count / chunking."""
    t_pad = n_chunks * chunk
    has_rest = layer_dim > 1

    def kernel(*refs):
        i = 0
        x_ref = refs[i]; i += 1                    # (chunk*b_pad, D_in)
        h0_ref = refs[i]; i += 1                   # (L, b_pad, H_pad)
        wih0_ref = refs[i]; i += 1                 # (D_in, H_pad)
        wih_rest_ref = None
        if has_rest:
            wih_rest_ref = refs[i]; i += 1         # (L-1, H_pad, H_pad)
        whh_ref = refs[i]; i += 1                  # (L, H_pad, H_pad)
        bias_ref = refs[i]; i += 1                 # (L, 1, H_pad)
        wfc_ref = refs[i]; i += 1                  # (H_pad, O_pad)
        bfc_ref = refs[i]; i += 1                  # (1, O_pad)
        out_ref = refs[i]; i += 1                  # (b_pad, O_pad)
        h_carry = refs[i]; i += 1                  # VMEM (L, b_pad, H_pad)
        buf0 = refs[i]; i += 1                     # VMEM (chunk*b_pad, H_pad)
        buf1 = refs[i]; i += 1                     # VMEM (chunk*b_pad, H_pad)

        c = pl.program_id(0)

        @pl.when(c == 0)
        def _():
            h_carry[...] = h0_ref[...]

        def run_layers(masked):
            # Layer-by-layer over the whole chunk; per-layer hidden state is
            # carried across chunks in h_carry[l].
            src = x_ref
            bufs = (buf0, buf1)
            for l in range(layer_dim):
                dst = bufs[l % 2]
                wih = wih0_ref[...] if l == 0 else wih_rest_ref[l - 1]
                # Hoisted input projection + bias for the whole chunk:
                # one MXU-shaped matmul per layer per chunk.
                dst[...] = (
                    jnp.dot(src[...], wih, preferred_element_type=jnp.float32)
                    + bias_ref[l]
                )
                whh = whh_ref[l]                    # hoisted out of the loop
                write_back = l < layer_dim - 1      # last layer: only h matters

                def step(t, h, dst=dst, whh=whh, write_back=write_back):
                    start = pl.multiple_of(t * b_pad, b_pad)
                    xp_t = dst[pl.ds(start, b_pad), :]
                    h_new = jnp.tanh(
                        xp_t
                        + jnp.dot(h, whh, preferred_element_type=jnp.float32)
                    )
                    if masked:  # only compiled into the final-chunk body
                        h_new = jnp.where(c * chunk + t < seq_len, h_new, h)
                    if write_back:
                        dst[pl.ds(start, b_pad), :] = h_new
                    return h_new

                h_carry[l] = lax.fori_loop(0, chunk, step, h_carry[l],
                                           unroll=unroll)
                src = dst

        if t_pad == seq_len:
            run_layers(masked=False)
        else:
            @pl.when(c < n_chunks - 1)
            def _():
                run_layers(masked=False)

            @pl.when(c == n_chunks - 1)
            def _():
                run_layers(masked=True)

        # Fused FC head on the last timestep's hidden state of the last layer.
        @pl.when(c == n_chunks - 1)
        def _():
            out_ref[...] = (
                jnp.dot(h_carry[layer_dim - 1], wfc_ref[...],
                        preferred_element_type=jnp.float32)
                + bfc_ref[...]
            )

    return kernel


def _vmem_estimate(chunk, b_pad, d_in, h_pad, o_pad, layer_dim):
    """Rough resident-VMEM footprint (bytes) of the fused kernel."""
    f = 4  # f32
    rows = chunk * b_pad
    dbl = 2  # default double-buffering of pipelined blocks
    est = 0
    est += dbl * rows * d_in * f                            # x chunk
    est += dbl * layer_dim * b_pad * h_pad * f              # h0
    est += dbl * d_in * h_pad * f                           # W_ih layer 0
    est += dbl * max(layer_dim - 1, 0) * h_pad * h_pad * f  # W_ih layers 1..
    est += dbl * layer_dim * h_pad * h_pad * f              # W_hh
    est += dbl * layer_dim * 8 * h_pad * f                  # bias (sublane pad)
    est += dbl * (h_pad * o_pad + 8 * o_pad) * f            # FC
    est += dbl * b_pad * o_pad * f                          # out
    est += layer_dim * b_pad * h_pad * f                    # h carry scratch
    est += 2 * rows * h_pad * f                             # ping-pong buffers
    return est


def _fused_rnn_fc(x2d, h0_p, wih0_t, wih_rest_s, whh_s, bias_s, wfc_t, bfc,
                  *, layer_dim, seq_len, chunk, b_pad):
    rows_total, d_in = x2d.shape
    h_pad = whh_s.shape[-1]
    o_pad = wfc_t.shape[1]
    n_chunks = rows_total // (chunk * b_pad)
    t_pad = n_chunks * chunk
    unroll = max(1, min(chunk, 8))

    kernel = _make_fused_kernel(layer_dim=layer_dim, seq_len=seq_len,
                                chunk=chunk, b_pad=b_pad, n_chunks=n_chunks,
                                unroll=unroll)

    in_specs = [
        pl.BlockSpec((chunk * b_pad, d_in), lambda c: (c, 0)),
        pl.BlockSpec((layer_dim, b_pad, h_pad), lambda c: (0, 0, 0)),
        pl.BlockSpec((d_in, h_pad), lambda c: (0, 0)),
    ]
    operands = [x2d, h0_p, wih0_t]
    if layer_dim > 1:
        in_specs.append(
            pl.BlockSpec((layer_dim - 1, h_pad, h_pad), lambda c: (0, 0, 0)))
        operands.append(wih_rest_s)
    in_specs += [
        pl.BlockSpec((layer_dim, h_pad, h_pad), lambda c: (0, 0, 0)),
        pl.BlockSpec((layer_dim, 1, h_pad), lambda c: (0, 0, 0)),
        pl.BlockSpec((h_pad, o_pad), lambda c: (0, 0)),
        pl.BlockSpec((1, o_pad), lambda c: (0, 0)),
    ]
    operands += [whh_s, bias_s, wfc_t, bfc]

    # VMEM limit (covers all generations; <= 48 MiB keeps headroom on v7x).
    est = _vmem_estimate(chunk, b_pad, d_in, h_pad, o_pad, layer_dim)
    vmem_limit = int(min(max(2 * est + (4 << 20), 16 << 20), 48 << 20))

    # Advisory cost estimate for the XLA scheduler.
    flops = 2 * t_pad * b_pad * (d_in * h_pad + h_pad * h_pad)
    flops += (layer_dim - 1) * 2 * t_pad * b_pad * (2 * h_pad * h_pad)
    flops += 2 * b_pad * h_pad * o_pad
    transcendentals = layer_dim * t_pad * b_pad * h_pad
    bytes_accessed = 4 * (
        t_pad * b_pad * d_in + layer_dim * b_pad * h_pad + d_in * h_pad
        + max(layer_dim - 1, 0) * h_pad * h_pad + layer_dim * h_pad * h_pad
        + layer_dim * h_pad + h_pad * o_pad + o_pad + b_pad * o_pad)

    return pl.pallas_call(
        kernel,
        out_shape=jax.ShapeDtypeStruct((b_pad, o_pad), jnp.float32),
        grid_spec=pltpu.PrefetchScalarGridSpec(
            num_scalar_prefetch=0,
            grid=(n_chunks,),
            in_specs=in_specs,
            out_specs=pl.BlockSpec((b_pad, o_pad), lambda c: (0, 0)),
            scratch_shapes=[
                pltpu.VMEM((layer_dim, b_pad, h_pad), jnp.float32),   # h carry
                pltpu.VMEM((chunk * b_pad, h_pad), jnp.float32),      # buf0
                pltpu.VMEM((chunk * b_pad, h_pad), jnp.float32),      # buf1
            ],
        ),
        compiler_params=pltpu.CompilerParams(
            dimension_semantics=("arbitrary",),   # sequential recurrence
            vmem_limit_bytes=vmem_limit,
        ),
        cost_estimate=pl.CostEstimate(
            flops=int(flops),
            transcendentals=int(transcendentals),
            bytes_accessed=int(bytes_accessed),
        ),
    )(*operands)


# ---------------------------------------------------------------------------
# Forward pass (matches PyTorch RNN.forward(x, h0))
# ---------------------------------------------------------------------------
@functools.partial(jax.jit, static_argnames=("layer_dim",))
def rnn_forward(x, h0, params, layer_dim):
    """x: (B, T, input_dim) batch-first, h0: (layer_dim, B, H) -> (B, output_dim)."""
    B, T, D = x.shape
    H = params["rnn_l0"][0].shape[0]
    O = params["fc"][0].shape[0]

    b_pad = _round_up(B, 8)
    h_pad = _round_up(H, 128)
    o_pad = _round_up(O, 128)

    # Chunk sizing: target ~512 rows per grid step, shrink to fit a VMEM budget.
    chunk = min(T, max(1, 512 // b_pad))
    while chunk > 1 and _vmem_estimate(chunk, b_pad, D, h_pad, o_pad,
                                       layer_dim) > (24 << 20):
        chunk = max(1, chunk // 2)
    n_chunks = -(-T // chunk)
    t_pad = n_chunks * chunk

    # Layer-0 input: time-major, padded, flattened to a 2-D (rows, lanes) slab.
    x_tm = jnp.transpose(x, (1, 0, 2))
    x_tm = jnp.pad(x_tm, ((0, t_pad - T), (0, b_pad - B), (0, 0)))
    x2d = x_tm.reshape(t_pad * b_pad, D)

    h0_p = jnp.pad(h0, ((0, 0), (0, b_pad - B), (0, h_pad - H)))

    # Stack / pad weights (zero padding keeps padded lanes exactly zero).
    wih0 = params["rnn_l0"][0]
    wih0_t = jnp.pad(wih0.T, ((0, 0), (0, h_pad - H)))           # (D, H_pad)
    whh_list, bias_list, wih_rest_list = [], [], []
    for l in range(layer_dim):
        wih, whh, bih, bhh = params[f"rnn_l{l}"]
        whh_list.append(jnp.pad(whh.T, ((0, h_pad - H), (0, h_pad - H))))
        bias_list.append(jnp.pad((bih + bhh)[None, :], ((0, 0), (0, h_pad - H))))
        if l > 0:
            wih_rest_list.append(jnp.pad(wih.T, ((0, h_pad - H), (0, h_pad - H))))
    whh_s = jnp.stack(whh_list)                                   # (L, H_pad, H_pad)
    bias_s = jnp.stack(bias_list)                                 # (L, 1, H_pad)
    wih_rest_s = jnp.stack(wih_rest_list) if layer_dim > 1 else None

    w_fc, b_fc = params["fc"]
    wfc_t = jnp.pad(w_fc.T, ((0, h_pad - H), (0, o_pad - O)))     # (H_pad, O_pad)
    bfc = jnp.pad(b_fc[None, :], ((0, 0), (0, o_pad - O)))        # (1, O_pad)

    out_p = _fused_rnn_fc(x2d, h0_p, wih0_t, wih_rest_s, whh_s, bias_s,
                          wfc_t, bfc, layer_dim=layer_dim, seq_len=T,
                          chunk=chunk, b_pad=b_pad)
    return out_p[:B, :O]


# ---------------------------------------------------------------------------
# Pure-JAX reference (for correctness check)
# ---------------------------------------------------------------------------
def rnn_reference(x, h0, params, layer_dim):
    B, T, _ = x.shape
    layer_in = x
    for l in range(layer_dim):
        wih, whh, bih, bhh = params[f"rnn_l{l}"]
        h = h0[l]
        outs = []
        for t in range(T):
            h = jnp.tanh(layer_in[:, t, :] @ wih.T + bih + h @ whh.T + bhh)
            outs.append(h)
        layer_in = jnp.stack(outs, axis=1)
    w_fc, b_fc = params["fc"]
    return layer_in[:, -1, :] @ w_fc.T + b_fc


# ---------------------------------------------------------------------------
# Parameter init (PyTorch-style shapes, deterministic)
# ---------------------------------------------------------------------------
def init_params(key, input_dim, hidden_dim, layer_dim, output_dim):
    params = {}
    scale = 1.0 / jnp.sqrt(hidden_dim)
    for l in range(layer_dim):
        d_in = input_dim if l == 0 else hidden_dim
        key, k1, k2, k3, k4 = jax.random.split(key, 5)
        params[f"rnn_l{l}"] = (
            jax.random.uniform(k1, (hidden_dim, d_in), jnp.float32, -scale, scale),
            jax.random.uniform(k2, (hidden_dim, hidden_dim), jnp.float32, -scale, scale),
            jax.random.uniform(k3, (hidden_dim,), jnp.float32, -scale, scale),
            jax.random.uniform(k4, (hidden_dim,), jnp.float32, -scale, scale),
        )
    key, k1, k2 = jax.random.split(key, 3)
    params["fc"] = (
        jax.random.uniform(k1, (output_dim, hidden_dim), jnp.float32, -scale, scale),
        jax.random.uniform(k2, (output_dim,), jnp.float32, -scale, scale),
    )
    return params


# ---------------------------------------------------------------------------
if __name__ == "__main__":
    input_dim, hidden_dim, layer_dim, output_dim = 16, 32, 2, 8
    batch, seq = 2, 8

    key = jax.random.PRNGKey(0)
    key, kx = jax.random.split(key)
    x = jax.random.normal(kx, (batch, seq, input_dim), jnp.float32)
    h0 = jnp.zeros((layer_dim, batch, hidden_dim), jnp.float32)  # init_hidden

    params = init_params(key, input_dim, hidden_dim, layer_dim, output_dim)

    out = rnn_forward(x, h0, params, layer_dim)
    out = jax.block_until_ready(out)

    ref = rnn_reference(x, h0, params, layer_dim)
    assert out.shape == (batch, output_dim)
    # Tolerance allows for MXU f32 matmul pass differences vs XLA's reference.
    assert jnp.allclose(out, ref, atol=5e-3, rtol=5e-3), "mismatch vs JAX reference"

    print("KERNEL_OK")
</pallas_src>

<mosaic_0001>
module attributes {stable_mosaic.version = 11 : i64} {
  func.func @kernel(%arg0: i32, %arg1: memref<64x16xf32, #tpu.memory_space<vmem>>, %arg2: memref<2x8x128xf32, #tpu.memory_space<vmem>>, %arg3: memref<16x128xf32, #tpu.memory_space<vmem>>, %arg4: memref<1x128x128xf32, #tpu.memory_space<vmem>>, %arg5: memref<2x128x128xf32, #tpu.memory_space<vmem>>, %arg6: memref<2x1x128xf32, #tpu.memory_space<vmem>>, %arg7: memref<128x128xf32, #tpu.memory_space<vmem>>, %arg8: memref<1x128xf32, #tpu.memory_space<vmem>>, %arg9: memref<8x128xf32, #tpu.memory_space<vmem>>, %arg10: memref<2x8x128xf32, #tpu.memory_space<vmem>>, %arg11: memref<64x128xf32, #tpu.memory_space<vmem>>, %arg12: memref<64x128xf32, #tpu.memory_space<vmem>>) attributes {dimension_semantics = [#tpu.dimension_semantics<arbitrary>], iteration_bounds = array<i64: 1>, scalar_prefetch = 0 : i64, scratch_operands = 3 : i64, tpu.core_type = #tpu.core_type<tc>, window_params = [{transform_indices = @transform_0, window_bounds = array<i64: 64, 16>}, {pipeline_mode = #tpu.pipeline_mode<synchronous>, transform_indices = @transform_1, window_bounds = array<i64: 2, 8, 128>}, {pipeline_mode = #tpu.pipeline_mode<synchronous>, transform_indices = @transform_2, window_bounds = array<i64: 16, 128>}, {pipeline_mode = #tpu.pipeline_mode<synchronous>, transform_indices = @transform_3, window_bounds = array<i64: 1, 128, 128>}, {pipeline_mode = #tpu.pipeline_mode<synchronous>, transform_indices = @transform_4, window_bounds = array<i64: 2, 128, 128>}, {pipeline_mode = #tpu.pipeline_mode<synchronous>, transform_indices = @transform_5, window_bounds = array<i64: 2, 1, 128>}, {pipeline_mode = #tpu.pipeline_mode<synchronous>, transform_indices = @transform_6, window_bounds = array<i64: 128, 128>}, {pipeline_mode = #tpu.pipeline_mode<synchronous>, transform_indices = @transform_7, window_bounds = array<i64: 1, 128>}, {pipeline_mode = #tpu.pipeline_mode<synchronous>, transform_indices = @transform_8, window_bounds = array<i64: 8, 128>}]} {
    %c0_i32 = arith.constant 0 : i32
    %0 = arith.cmpi eq, %arg0, %c0_i32 : i32
    %1 = arith.extui %0 : i1 to i32
    %c0_i32_0 = arith.constant 0 : i32
    %2 = arith.cmpi ne, %1, %c0_i32_0 : i32
    scf.if %2 {
      %c0_105 = arith.constant 0 : index
      %c0_106 = arith.constant 0 : index
      %c0_107 = arith.constant 0 : index
      %165 = vector.load %arg2[%c0_105, %c0_106, %c0_107] : memref<2x8x128xf32, #tpu.memory_space<vmem>>, vector<2x8x128xf32>
      %c0_108 = arith.constant 0 : index
      %c0_109 = arith.constant 0 : index
      %c0_110 = arith.constant 0 : index
      %166 = vector.load %arg10[%c0_108, %c0_109, %c0_110] : memref<2x8x128xf32, #tpu.memory_space<vmem>>, vector<2x8x128xf32>
      tpu.vector_store %arg10[%c0_108, %c0_109, %c0_110], %165 {strides = array<i32>} : memref<2x8x128xf32, #tpu.memory_space<vmem>>, vector<2x8x128xf32>,
    } else {
    }
    %c0 = arith.constant 0 : index
    %c0_1 = arith.constant 0 : index
    %3 = vector.load %arg3[%c0, %c0_1] : memref<16x128xf32, #tpu.memory_space<vmem>>, vector<16x128xf32>
    %c0_2 = arith.constant 0 : index
    %c0_3 = arith.constant 0 : index
    %4 = vector.load %arg1[%c0_2, %c0_3] : memref<64x16xf32, #tpu.memory_space<vmem>>, vector<64x16xf32>
    %cst = arith.constant dense<0.000000e+00> : vector<64x128xf32>
    %5 = tpu.matmul %4, %3, %cst {dimension_numbers = #tpu.dot_dimension_numbers<[1], [0], [0], [1], [0, 0, 1, 1], [], []>} : vector<64x16xf32>, vector<16x128xf32>, vector<64x128xf32> -> vector<64x128xf32>
    %c0_4 = arith.constant 0 : index
    %c0_5 = arith.constant 0 : index
    %c0_6 = arith.constant 0 : index
    %6 = vector.load %arg6[%c0_4, %c0_5, %c0_6] : memref<2x1x128xf32, #tpu.memory_space<vmem>>, vector<1x1x128xf32>
    %7 = vector.shape_cast %6 : vector<1x1x128xf32> to vector<1x128xf32>
    %8 = vector.broadcast %7 : vector<1x128xf32> to vector<64x128xf32>
    %9 = arith.addf %5, %8 : vector<64x128xf32>
    %c0_7 = arith.constant 0 : index
    %c0_8 = arith.constant 0 : index
    %10 = vector.load %arg11[%c0_7, %c0_8] : memref<64x128xf32, #tpu.memory_space<vmem>>, vector<64x128xf32>
    tpu.vector_store %arg11[%c0_7, %c0_8], %9 {strides = array<i32>} : memref<64x128xf32, #tpu.memory_space<vmem>>, vector<64x128xf32>,
    %c0_9 = arith.constant 0 : index
    %c0_10 = arith.constant 0 : index
    %c0_11 = arith.constant 0 : index
    %11 = vector.load %arg5[%c0_9, %c0_10, %c0_11] : memref<2x128x128xf32, #tpu.memory_space<vmem>>, vector<1x128x128xf32>
    %12 = vector.shape_cast %11 : vector<1x128x128xf32> to vector<128x128xf32>
    %c0_12 = arith.constant 0 : index
    %c0_13 = arith.constant 0 : index
    %c0_14 = arith.constant 0 : index
    %13 = vector.load %arg10[%c0_12, %c0_13, %c0_14] : memref<2x8x128xf32, #tpu.memory_space<vmem>>, vector<1x8x128xf32>
    %14 = vector.shape_cast %13 : vector<1x8x128xf32> to vector<8x128xf32>
    %c0_i32_15 = arith.constant 0 : i32
    %c8_i32 = arith.constant 8 : i32
    %15 = arith.muli %c0_i32_15, %c8_i32 : i32
    %16 = tpu.assume_multiple %15, 8 : i32
    %17 = arith.index_cast %16 : i32 to index
    %c0_16 = arith.constant 0 : index
    %18 = vector.load %arg11[%17, %c0_16] : memref<64x128xf32, #tpu.memory_space<vmem>>, vector<8x128xf32>
    %cst_17 = arith.constant dense<0.000000e+00> : vector<8x128xf32>
    %19 = tpu.matmul %14, %12, %cst_17 {dimension_numbers = #tpu.dot_dimension_numbers<[1], [0], [0], [1], [0, 0, 1, 1], [], []>} : vector<8x128xf32>, vector<128x128xf32>, vector<8x128xf32> -> vector<8x128xf32>
    %20 = arith.addf %18, %19 : vector<8x128xf32>
    %21 = math.tanh %20 : vector<8x128xf32>
    %22 = arith.index_cast %16 : i32 to index
    %c0_18 = arith.constant 0 : index
    %23 = vector.load %arg11[%22, %c0_18] : memref<64x128xf32, #tpu.memory_space<vmem>>, vector<8x128xf32>
    tpu.vector_store %arg11[%22, %c0_18], %21 {strides = array<i32>} : memref<64x128xf32, #tpu.memory_space<vmem>>, vector<8x128xf32>,
    %c1_i32 = arith.constant 1 : i32
    %c8_i32_19 = arith.constant 8 : i32
    %24 = arith.muli %c1_i32, %c8_i32_19 : i32
    %25 = tpu.assume_multiple %24, 8 : i32
    %26 = arith.index_cast %25 : i32 to index
    %c0_20 = arith.constant 0 : index
    %27 = vector.load %arg11[%26, %c0_20] : memref<64x128xf32, #tpu.memory_space<vmem>>, vector<8x128xf32>
    %cst_21 = arith.constant dense<0.000000e+00> : vector<8x128xf32>
    %28 = tpu.matmul %21, %12, %cst_21 {dimension_numbers = #tpu.dot_dimension_numbers<[1], [0], [0], [1], [0, 0, 1, 1], [], []>} : vector<8x128xf32>, vector<128x128xf32>, vector<8x128xf32> -> vector<8x128xf32>
    %29 = arith.addf %27, %28 : vector<8x128xf32>
    %30 = math.tanh %29 : vector<8x128xf32>
    %31 = arith.index_cast %25 : i32 to index
    %c0_22 = arith.constant 0 : index
    %32 = vector.load %arg11[%31, %c0_22] : memref<64x128xf32, #tpu.memory_space<vmem>>, vector<8x128xf32>
    tpu.vector_store %arg11[%31, %c0_22], %30 {strides = array<i32>} : memref<64x128xf32, #tpu.memory_space<vmem>>, vector<8x128xf32>,
    %c2_i32 = arith.constant 2 : i32
    %c8_i32_23 = arith.constant 8 : i32
    %33 = arith.muli %c2_i32, %c8_i32_23 : i32
    %34 = tpu.assume_multiple %33, 8 : i32
    %35 = arith.index_cast %34 : i32 to index
    %c0_24 = arith.constant 0 : index
    %36 = vector.load %arg11[%35, %c0_24] : memref<64x128xf32, #tpu.memory_space<vmem>>, vector<8x128xf32>
    %cst_25 = arith.constant dense<0.000000e+00> : vector<8x128xf32>
    %37 = tpu.matmul %30, %12, %cst_25 {dimension_numbers = #tpu.dot_dimension_numbers<[1], [0], [0], [1], [0, 0, 1, 1], [], []>} : vector<8x128xf32>, vector<128x128xf32>, vector<8x128xf32> -> vector<8x128xf32>
    %38 = arith.addf %36, %37 : vector<8x128xf32>
    %39 = math.tanh %38 : vector<8x128xf32>
    %40 = arith.index_cast %34 : i32 to index
    %c0_26 = arith.constant 0 : index
    %41 = vector.load %arg11[%40, %c0_26] : memref<64x128xf32, #tpu.memory_space<vmem>>, vector<8x128xf32>
    tpu.vector_store %arg11[%40, %c0_26], %39 {strides = array<i32>} : memref<64x128xf32, #tpu.memory_space<vmem>>, vector<8x128xf32>,
    %c3_i32 = arith.constant 3 : i32
    %c8_i32_27 = arith.constant 8 : i32
    %42 = arith.muli %c3_i32, %c8_i32_27 : i32
    %43 = tpu.assume_multiple %42, 8 : i32
    %44 = arith.index_cast %43 : i32 to index
    %c0_28 = arith.constant 0 : index
    %45 = vector.load %arg11[%44, %c0_28] : memref<64x128xf32, #tpu.memory_space<vmem>>, vector<8x128xf32>
    %cst_29 = arith.constant dense<0.000000e+00> : vector<8x128xf32>
    %46 = tpu.matmul %39, %12, %cst_29 {dimension_numbers = #tpu.dot_dimension_numbers<[1], [0], [0], [1], [0, 0, 1, 1], [], []>} : vector<8x128xf32>, vector<128x128xf32>, vector<8x128xf32> -> vector<8x128xf32>
    %47 = arith.addf %45, %46 : vector<8x128xf32>
    %48 = math.tanh %47 : vector<8x128xf32>
    %49 = arith.index_cast %43 : i32 to index
    %c0_30 = arith.constant 0 : index
    %50 = vector.load %arg11[%49, %c0_30] : memref<64x128xf32, #tpu.memory_space<vmem>>, vector<8x128xf32>
    tpu.vector_store %arg11[%49, %c0_30], %48 {strides = array<i32>} : memref<64x128xf32, #tpu.memory_space<vmem>>, vector<8x128xf32>,
    %c4_i32 = arith.constant 4 : i32
    %c8_i32_31 = arith.constant 8 : i32
    %51 = arith.muli %c4_i32, %c8_i32_31 : i32
    %52 = tpu.assume_multiple %51, 8 : i32
    %53 = arith.index_cast %52 : i32 to index
    %c0_32 = arith.constant 0 : index
    %54 = vector.load %arg11[%53, %c0_32] : memref<64x128xf32, #tpu.memory_space<vmem>>, vector<8x128xf32>
    %cst_33 = arith.constant dense<0.000000e+00> : vector<8x128xf32>
    %55 = tpu.matmul %48, %12, %cst_33 {dimension_numbers = #tpu.dot_dimension_numbers<[1], [0], [0], [1], [0, 0, 1, 1], [], []>} : vector<8x128xf32>, vector<128x128xf32>, vector<8x128xf32> -> vector<8x128xf32>
    %56 = arith.addf %54, %55 : vector<8x128xf32>
    %57 = math.tanh %56 : vector<8x128xf32>
    %58 = arith.index_cast %52 : i32 to index
    %c0_34 = arith.constant 0 : index
    %59 = vector.load %arg11[%58, %c0_34] : memref<64x128xf32, #tpu.memory_space<vmem>>, vector<8x128xf32>
    tpu.vector_store %arg11[%58, %c0_34], %57 {strides = array<i32>} : memref<64x128xf32, #tpu.memory_space<vmem>>, vector<8x128xf32>,
    %c5_i32 = arith.constant 5 : i32
    %c8_i32_35 = arith.constant 8 : i32
    %60 = arith.muli %c5_i32, %c8_i32_35 : i32
    %61 = tpu.assume_multiple %60, 8 : i32
    %62 = arith.index_cast %61 : i32 to index
    %c0_36 = arith.constant 0 : index
    %63 = vector.load %arg11[%62, %c0_36] : memref<64x128xf32, #tpu.memory_space<vmem>>, vector<8x128xf32>
    %cst_37 = arith.constant dense<0.000000e+00> : vector<8x128xf32>
    %64 = tpu.matmul %57, %12, %cst_37 {dimension_numbers = #tpu.dot_dimension_numbers<[1], [0], [0], [1], [0, 0, 1, 1], [], []>} : vector<8x128xf32>, vector<128x128xf32>, vector<8x128xf32> -> vector<8x128xf32>
    %65 = arith.addf %63, %64 : vector<8x128xf32>
    %66 = math.tanh %65 : vector<8x128xf32>
    %67 = arith.index_cast %61 : i32 to index
    %c0_38 = arith.constant 0 : index
    %68 = vector.load %arg11[%67, %c0_38] : memref<64x128xf32, #tpu.memory_space<vmem>>, vector<8x128xf32>
    tpu.vector_store %arg11[%67, %c0_38], %66 {strides = array<i32>} : memref<64x128xf32, #tpu.memory_space<vmem>>, vector<8x128xf32>,
    %c6_i32 = arith.constant 6 : i32
    %c8_i32_39 = arith.constant 8 : i32
    %69 = arith.muli %c6_i32, %c8_i32_39 : i32
    %70 = tpu.assume_multiple %69, 8 : i32
    %71 = arith.index_cast %70 : i32 to index
    %c0_40 = arith.constant 0 : index
    %72 = vector.load %arg11[%71, %c0_40] : memref<64x128xf32, #tpu.memory_space<vmem>>, vector<8x128xf32>
    %cst_41 = arith.constant dense<0.000000e+00> : vector<8x128xf32>
    %73 = tpu.matmul %66, %12, %cst_41 {dimension_numbers = #tpu.dot_dimension_numbers<[1], [0], [0], [1], [0, 0, 1, 1], [], []>} : vector<8x128xf32>, vector<128x128xf32>, vector<8x128xf32> -> vector<8x128xf32>
    %74 = arith.addf %72, %73 : vector<8x128xf32>
    %75 = math.tanh %74 : vector<8x128xf32>
    %76 = arith.index_cast %70 : i32 to index
    %c0_42 = arith.constant 0 : index
    %77 = vector.load %arg11[%76, %c0_42] : memref<64x128xf32, #tpu.memory_space<vmem>>, vector<8x128xf32>
    tpu.vector_store %arg11[%76, %c0_42], %75 {strides = array<i32>} : memref<64x128xf32, #tpu.memory_space<vmem>>, vector<8x128xf32>,
    %c7_i32 = arith.constant 7 : i32
    %c8_i32_43 = arith.constant 8 : i32
    %78 = arith.muli %c7_i32, %c8_i32_43 : i32
    %79 = tpu.assume_multiple %78, 8 : i32
    %80 = arith.index_cast %79 : i32 to index
    %c0_44 = arith.constant 0 : index
    %81 = vector.load %arg11[%80, %c0_44] : memref<64x128xf32, #tpu.memory_space<vmem>>, vector<8x128xf32>
    %cst_45 = arith.constant dense<0.000000e+00> : vector<8x128xf32>
    %82 = tpu.matmul %75, %12, %cst_45 {dimension_numbers = #tpu.dot_dimension_numbers<[1], [0], [0], [1], [0, 0, 1, 1], [], []>} : vector<8x128xf32>, vector<128x128xf32>, vector<8x128xf32> -> vector<8x128xf32>
    %83 = arith.addf %81, %82 : vector<8x128xf32>
    %84 = math.tanh %83 : vector<8x128xf32>
    %85 = arith.index_cast %79 : i32 to index
    %c0_46 = arith.constant 0 : index
    %86 = vector.load %arg11[%85, %c0_46] : memref<64x128xf32, #tpu.memory_space<vmem>>, vector<8x128xf32>
    tpu.vector_store %arg11[%85, %c0_46], %84 {strides = array<i32>} : memref<64x128xf32, #tpu.memory_space<vmem>>, vector<8x128xf32>,
    %c8_i32_47 = arith.constant 8 : i32
    %c0_48 = arith.constant 0 : index
    %c0_49 = arith.constant 0 : index
    %c0_50 = arith.constant 0 : index
    %87 = vector.load %arg10[%c0_48, %c0_49, %c0_50] : memref<2x8x128xf32, #tpu.memory_space<vmem>>, vector<1x8x128xf32>
    %88 = vector.shape_cast %87 : vector<1x8x128xf32> to vector<8x128xf32>
    %89 = vector.shape_cast %84 : vector<8x128xf32> to vector<1x8x128xf32>
    tpu.vector_store %arg10[%c0_48, %c0_49, %c0_50], %89 {strides = array<i32>} : memref<2x8x128xf32, #tpu.memory_space<vmem>>, vector<1x8x128xf32>,
    %c0_51 = arith.constant 0 : index
    %c0_52 = arith.constant 0 : index
    %c0_53 = arith.constant 0 : index
    %90 = vector.load %arg4[%c0_51, %c0_52, %c0_53] : memref<1x128x128xf32, #tpu.memory_space<vmem>>, vector<1x128x128xf32>
    %91 = vector.shape_cast %90 : vector<1x128x128xf32> to vector<128x128xf32>
    %c0_54 = arith.constant 0 : index
    %c0_55 = arith.constant 0 : index
    %92 = vector.load %arg11[%c0_54, %c0_55] : memref<64x128xf32, #tpu.memory_space<vmem>>, vector<64x128xf32>
    %cst_56 = arith.constant dense<0.000000e+00> : vector<64x128xf32>
    %93 = tpu.matmul %92, %91, %cst_56 {dimension_numbers = #tpu.dot_dimension_numbers<[1], [0], [0], [1], [0, 0, 1, 1], [], []>} : vector<64x128xf32>, vector<128x128xf32>, vector<64x128xf32> -> vector<64x128xf32>
    %c1 = arith.constant 1 : index
    %c0_57 = arith.constant 0 : index
    %c0_58 = arith.constant 0 : index
    %94 = vector.load %arg6[%c1, %c0_57, %c0_58] : memref<2x1x128xf32, #tpu.memory_space<vmem>>, vector<1x1x128xf32>
    %95 = vector.shape_cast %94 : vector<1x1x128xf32> to vector<1x128xf32>
    %96 = vector.broadcast %95 : vector<1x128xf32> to vector<64x128xf32>
    %97 = arith.addf %93, %96 : vector<64x128xf32>
    %c0_59 = arith.constant 0 : index
    %c0_60 = arith.constant 0 : index
    %98 = vector.load %arg12[%c0_59, %c0_60] : memref<64x128xf32, #tpu.memory_space<vmem>>, vector<64x128xf32>
    tpu.vector_store %arg12[%c0_59, %c0_60], %97 {strides = array<i32>} : memref<64x128xf32, #tpu.memory_space<vmem>>, vector<64x128xf32>,
    %c1_61 = arith.constant 1 : index
    %c0_62 = arith.constant 0 : index
    %c0_63 = arith.constant 0 : index
    %99 = vector.load %arg5[%c1_61, %c0_62, %c0_63] : memref<2x128x128xf32, #tpu.memory_space<vmem>>, vector<1x128x128xf32>
    %100 = vector.shape_cast %99 : vector<1x128x128xf32> to vector<128x128xf32>
    %c1_64 = arith.constant 1 : index
    %c0_65 = arith.constant 0 : index
    %c0_66 = arith.constant 0 : index
    %101 = vector.load %arg10[%c1_64, %c0_65, %c0_66] : memref<2x8x128xf32, #tpu.memory_space<vmem>>, vector<1x8x128xf32>
    %102 = vector.shape_cast %101 : vector<1x8x128xf32> to vector<8x128xf32>
    %c0_i32_67 = arith.constant 0 : i32
    %c8_i32_68 = arith.constant 8 : i32
    %103 = arith.muli %c0_i32_67, %c8_i32_68 : i32
    %104 = tpu.assume_multiple %103, 8 : i32
    %105 = arith.index_cast %104 : i32 to index
    %c0_69 = arith.constant 0 : index
    %106 = vector.load %arg12[%105, %c0_69] : memref<64x128xf32, #tpu.memory_space<vmem>>, vector<8x128xf32>
    %cst_70 = arith.constant dense<0.000000e+00> : vector<8x128xf32>
    %107 = tpu.matmul %102, %100, %cst_70 {dimension_numbers = #tpu.dot_dimension_numbers<[1], [0], [0], [1], [0, 0, 1, 1], [], []>} : vector<8x128xf32>, vector<128x128xf32>, vector<8x128xf32> -> vector<8x128xf32>
    %108 = arith.addf %106, %107 : vector<8x128xf32>
    %109 = math.tanh %108 : vector<8x128xf32>
    %c1_i32_71 = arith.constant 1 : i32
    %c8_i32_72 = arith.constant 8 : i32
    %110 = arith.muli %c1_i32_71, %c8_i32_72 : i32
    %111 = tpu.assume_multiple %110, 8 : i32
    %112 = arith.index_cast %111 : i32 to index
    %c0_73 = arith.constant 0 : index
    %113 = vector.load %arg12[%112, %c0_73] : memref<64x128xf32, #tpu.memory_space<vmem>>, vector<8x128xf32>
    %cst_74 = arith.constant dense<0.000000e+00> : vector<8x128xf32>
    %114 = tpu.matmul %109, %100, %cst_74 {dimension_numbers = #tpu.dot_dimension_numbers<[1], [0], [0], [1], [0, 0, 1, 1], [], []>} : vector<8x128xf32>, vector<128x128xf32>, vector<8x128xf32> -> vector<8x128xf32>
    %115 = arith.addf %113, %114 : vector<8x128xf32>
    %116 = math.tanh %115 : vector<8x128xf32>
    %c2_i32_75 = arith.constant 2 : i32
    %c8_i32_76 = arith.constant 8 : i32
    %117 = arith.muli %c2_i32_75, %c8_i32_76 : i32
    %118 = tpu.assume_multiple %117, 8 : i32
    %119 = arith.index_cast %118 : i32 to index
    %c0_77 = arith.constant 0 : index
    %120 = vector.load %arg12[%119, %c0_77] : memref<64x128xf32, #tpu.memory_space<vmem>>, vector<8x128xf32>
    %cst_78 = arith.constant dense<0.000000e+00> : vector<8x128xf32>
    %121 = tpu.matmul %116, %100, %cst_78 {dimension_numbers = #tpu.dot_dimension_numbers<[1], [0], [0], [1], [0, 0, 1, 1], [], []>} : vector<8x128xf32>, vector<128x128xf32>, vector<8x128xf32> -> vector<8x128xf32>
    %122 = arith.addf %120, %121 : vector<8x128xf32>
    %123 = math.tanh %122 : vector<8x128xf32>
    %c3_i32_79 = arith.constant 3 : i32
    %c8_i32_80 = arith.constant 8 : i32
    %124 = arith.muli %c3_i32_79, %c8_i32_80 : i32
    %125 = tpu.assume_multiple %124, 8 : i32
    %126 = arith.index_cast %125 : i32 to index
    %c0_81 = arith.constant 0 : index
    %127 = vector.load %arg12[%126, %c0_81] : memref<64x128xf32, #tpu.memory_space<vmem>>, vector<8x128xf32>
    %cst_82 = arith.constant dense<0.000000e+00> : vector<8x128xf32>
    %128 = tpu.matmul %123, %100, %cst_82 {dimension_numbers = #tpu.dot_dimension_numbers<[1], [0], [0], [1], [0, 0, 1, 1], [], []>} : vector<8x128xf32>, vector<128x128xf32>, vector<8x128xf32> -> vector<8x128xf32>
    %129 = arith.addf %127, %128 : vector<8x128xf32>
    %130 = math.tanh %129 : vector<8x128xf32>
    %c4_i32_83 = arith.constant 4 : i32
    %c8_i32_84 = arith.constant 8 : i32
    %131 = arith.muli %c4_i32_83, %c8_i32_84 : i32
    %132 = tpu.assume_multiple %131, 8 : i32
    %133 = arith.index_cast %132 : i32 to index
    %c0_85 = arith.constant 0 : index
    %134 = vector.load %arg12[%133, %c0_85] : memref<64x128xf32, #tpu.memory_space<vmem>>, vector<8x128xf32>
    %cst_86 = arith.constant dense<0.000000e+00> : vector<8x128xf32>
    %135 = tpu.matmul %130, %100, %cst_86 {dimension_numbers = #tpu.dot_dimension_numbers<[1], [0], [0], [1], [0, 0, 1, 1], [], []>} : vector<8x128xf32>, vector<128x128xf32>, vector<8x128xf32> -> vector<8x128xf32>
    %136 = arith.addf %134, %135 : vector<8x128xf32>
    %137 = math.tanh %136 : vector<8x128xf32>
    %c5_i32_87 = arith.constant 5 : i32
    %c8_i32_88 = arith.constant 8 : i32
    %138 = arith.muli %c5_i32_87, %c8_i32_88 : i32
    %139 = tpu.assume_multiple %138, 8 : i32
    %140 = arith.index_cast %139 : i32 to index
    %c0_89 = arith.constant 0 : index
    %141 = vector.load %arg12[%140, %c0_89] : memref<64x128xf32, #tpu.memory_space<vmem>>, vector<8x128xf32>
    %cst_90 = arith.constant dense<0.000000e+00> : vector<8x128xf32>
    %142 = tpu.matmul %137, %100, %cst_90 {dimension_numbers = #tpu.dot_dimension_numbers<[1], [0], [0], [1], [0, 0, 1, 1], [], []>} : vector<8x128xf32>, vector<128x128xf32>, vector<8x128xf32> -> vector<8x128xf32>
    %143 = arith.addf %141, %142 : vector<8x128xf32>
    %144 = math.tanh %143 : vector<8x128xf32>
    %c6_i32_91 = arith.constant 6 : i32
    %c8_i32_92 = arith.constant 8 : i32
    %145 = arith.muli %c6_i32_91, %c8_i32_92 : i32
    %146 = tpu.assume_multiple %145, 8 : i32
    %147 = arith.index_cast %146 : i32 to index
    %c0_93 = arith.constant 0 : index
    %148 = vector.load %arg12[%147, %c0_93] : memref<64x128xf32, #tpu.memory_space<vmem>>, vector<8x128xf32>
    %cst_94 = arith.constant dense<0.000000e+00> : vector<8x128xf32>
    %149 = tpu.matmul %144, %100, %cst_94 {dimension_numbers = #tpu.dot_dimension_numbers<[1], [0], [0], [1], [0, 0, 1, 1], [], []>} : vector<8x128xf32>, vector<128x128xf32>, vector<8x128xf32> -> vector<8x128xf32>
    %150 = arith.addf %148, %149 : vector<8x128xf32>
    %151 = math.tanh %150 : vector<8x128xf32>
    %c7_i32_95 = arith.constant 7 : i32
    %c8_i32_96 = arith.constant 8 : i32
    %152 = arith.muli %c7_i32_95, %c8_i32_96 : i32
    %153 = tpu.assume_multiple %152, 8 : i32
    %154 = arith.index_cast %153 : i32 to index
    %c0_97 = arith.constant 0 : index
    %155 = vector.load %arg12[%154, %c0_97] : memref<64x128xf32, #tpu.memory_space<vmem>>, vector<8x128xf32>
    %cst_98 = arith.constant dense<0.000000e+00> : vector<8x128xf32>
    %156 = tpu.matmul %151, %100, %cst_98 {dimension_numbers = #tpu.dot_dimension_numbers<[1], [0], [0], [1], [0, 0, 1, 1], [], []>} : vector<8x128xf32>, vector<128x128xf32>, vector<8x128xf32> -> vector<8x128xf32>
    %157 = arith.addf %155, %156 : vector<8x128xf32>
    %158 = math.tanh %157 : vector<8x128xf32>
    %c8_i32_99 = arith.constant 8 : i32
    %c1_100 = arith.constant 1 : index
    %c0_101 = arith.constant 0 : index
    %c0_102 = arith.constant 0 : index
    %159 = vector.load %arg10[%c1_100, %c0_101, %c0_102] : memref<2x8x128xf32, #tpu.memory_space<vmem>>, vector<1x8x128xf32>
    %160 = vector.shape_cast %159 : vector<1x8x128xf32> to vector<8x128xf32>
    %161 = vector.shape_cast %158 : vector<8x128xf32> to vector<1x8x128xf32>
    tpu.vector_store %arg10[%c1_100, %c0_101, %c0_102], %161 {strides = array<i32>} : memref<2x8x128xf32, #tpu.memory_space<vmem>>, vector<1x8x128xf32>,
    %c0_i32_103 = arith.constant 0 : i32
    %162 = arith.cmpi eq, %arg0, %c0_i32_103 : i32
    %163 = arith.extui %162 : i1 to i32
    %c0_i32_104 = arith.constant 0 : i32
    %164 = arith.cmpi ne, %163, %c0_i32_104 : i32
    scf.if %164 {
      %c1_105 = arith.constant 1 : index
      %c0_106 = arith.constant 0 : index
      %c0_107 = arith.constant 0 : index
      %165 = vector.load %arg10[%c1_105, %c0_106, %c0_107] : memref<2x8x128xf32, #tpu.memory_space<vmem>>, vector<1x8x128xf32>
      %166 = vector.shape_cast %165 : vector<1x8x128xf32> to vector<8x128xf32>
      %c0_108 = arith.constant 0 : index
      %c0_109 = arith.constant 0 : index
      %167 = vector.load %arg7[%c0_108, %c0_109] : memref<128x128xf32, #tpu.memory_space<vmem>>, vector<128x128xf32>
      %cst_110 = arith.constant dense<0.000000e+00> : vector<8x128xf32>
      %168 = tpu.matmul %166, %167, %cst_110 {dimension_numbers = #tpu.dot_dimension_numbers<[1], [0], [0], [1], [0, 0, 1, 1], [], []>} : vector<8x128xf32>, vector<128x128xf32>, vector<8x128xf32> -> vector<8x128xf32>
      %c0_111 = arith.constant 0 : index
      %c0_112 = arith.constant 0 : index
      %169 = vector.load %arg8[%c0_111, %c0_112] : memref<1x128xf32, #tpu.memory_space<vmem>>, vector<1x128xf32>
      %170 = vector.broadcast %169 : vector<1x128xf32> to vector<8x128xf32>
      %171 = arith.addf %168, %170 : vector<8x128xf32>
      %c0_113 = arith.constant 0 : index
      %c0_114 = arith.constant 0 : index
      %172 = vector.load %arg9[%c0_113, %c0_114] : memref<8x128xf32, #tpu.memory_space<vmem>>, vector<8x128xf32>
      tpu.vector_store %arg9[%c0_113, %c0_114], %171 {strides = array<i32>} : memref<8x128xf32, #tpu.memory_space<vmem>>, vector<8x128xf32>,
    } else {
    }
    return
  }
  func.func @transform_0(%arg0: i32) -> (i32, i32) {
    %c0_i32 = arith.constant 0 : i32
    %c0_i32_0 = arith.constant 0 : i32
    return %arg0, %c0_i32 : i32, i32
  }
  func.func @transform_1(%arg0: i32) -> (i32, i32, i32) {
    %c0_i32 = arith.constant 0 : i32
    %c0_i32_0 = arith.constant 0 : i32
    %c0_i32_1 = arith.constant 0 : i32
    %c0_i32_2 = arith.constant 0 : i32
    return %c0_i32, %c0_i32_0, %c0_i32_1 : i32, i32, i32
  }
  func.func @transform_2(%arg0: i32) -> (i32, i32) {
    %c0_i32 = arith.constant 0 : i32
    %c0_i32_0 = arith.constant 0 : i32
    %c0_i32_1 = arith.constant 0 : i32
    return %c0_i32, %c0_i32_0 : i32, i32
  }
  func.func @transform_3(%arg0: i32) -> (i32, i32, i32) {
    %c0_i32 = arith.constant 0 : i32
    %c0_i32_0 = arith.constant 0 : i32
    %c0_i32_1 = arith.constant 0 : i32
    %c0_i32_2 = arith.constant 0 : i32
    return %c0_i32, %c0_i32_0, %c0_i32_1 : i32, i32, i32
  }
  func.func @transform_4(%arg0: i32) -> (i32, i32, i32) {
    %c0_i32 = arith.constant 0 : i32
    %c0_i32_0 = arith.constant 0 : i32
    %c0_i32_1 = arith.constant 0 : i32
    %c0_i32_2 = arith.constant 0 : i32
    return %c0_i32, %c0_i32_0, %c0_i32_1 : i32, i32, i32
  }
  func.func @transform_5(%arg0: i32) -> (i32, i32, i32) {
    %c0_i32 = arith.constant 0 : i32
    %c0_i32_0 = arith.constant 0 : i32
    %c0_i32_1 = arith.constant 0 : i32
    %c0_i32_2 = arith.constant 0 : i32
    return %c0_i32, %c0_i32_0, %c0_i32_1 : i32, i32, i32
  }
  func.func @transform_6(%arg0: i32) -> (i32, i32) {
    %c0_i32 = arith.constant 0 : i32
    %c0_i32_0 = arith.constant 0 : i32
    %c0_i32_1 = arith.constant 0 : i32
    return %c0_i32, %c0_i32_0 : i32, i32
  }
  func.func @transform_7(%arg0: i32) -> (i32, i32) {
    %c0_i32 = arith.constant 0 : i32
    %c0_i32_0 = arith.constant 0 : i32
    %c0_i32_1 = arith.constant 0 : i32
    return %c0_i32, %c0_i32_0 : i32, i32
  }
  func.func @transform_8(%arg0: i32) -> (i32, i32) {
    %c0_i32 = arith.constant 0 : i32
    %c0_i32_0 = arith.constant 0 : i32
    %c0_i32_1 = arith.constant 0 : i32
    return %c0_i32, %c0_i32_0 : i32, i32
  }
}

</mosaic_0001>

<bundles_post_ra>
// kernel: rnn_forward.1
= control target key start
LH: loop header
LB: loop body
LE: loop exit
PB: predicated region body
PF: predicated region fallthrough
CT: control target
= control target key end

     0   :  { %v3152_v0 = vmov 0.0|0.0   ;;  %vm3153_vm0 = vmmov 0   ;;  %v3154_v4 = vmov 0.0   ;;  %vm54_vm1 = vcmask 130048   ;;  %s3851_s4 = inlined_call_operand.vmem [shape: f32[2,128,128], index: 4, kind: input, shape index: {}]   ;;  %s3852_s2 = inlined_call_operand.vmem [shape: f32[16,128], index: 2, kind: input, shape index: {}]   ;;  %s3853_s0 = inlined_call_operand.vmem [shape: f32[64,16], index: 0, kind: input, shape index: {}]   ;;  %s3854_s1 = inlined_call_operand.vmem [shape: f32[2,8,128], index: 1, kind: input, shape index: {}]   ;;  %s3855_s5 = inlined_call_operand.vmem [shape: f32[2,1,128], index: 5, kind: input, shape index: {}]   ;;  %s3856_s3 = inlined_call_operand.vmem [shape: f32[1,128,128], index: 3, kind: input, shape index: {}]   ;;  %s3857_s6 = inlined_call_operand.vmem [shape: f32[128,128], index: 6, kind: input, shape index: {}]   ;;  %s3858_s7 = inlined_call_operand.vmem [shape: f32[1,128], index: 7, kind: input, shape index: {}]   ;;  %s3859_s8 = inlined_call_operand.vmem [shape: f32[8,128], index: 8, kind: output, shape index: {}]  }
   0x1   :  { %2677 = vmatprep.subr.bf16.mxu1 %v3152_v0  ;;  %v192_v1 = vld [vmem:[%s3851_s4] sm:$0xff]  ;;  %v193_v2 = vld [vmem:[%s3851_s4 + $0x8] sm:$0xff]  ;;  %v194_v3 = vld [vmem:[%s3851_s4 + $0x10] sm:$0xff]  ;;  %2066 = vmatprep.mubr.msk.f32.mxu1 %vm3153_vm0, %v3154_v4 }
   0x2   :  { %v3212_v5 = vpack.c.bf16 %v193_v2, %v192_v1  ;;  %v195_v6 = vld [vmem:[%s3851_s4 + $0x18] sm:$0xff]  ;;  %v196_v8 = vld [vmem:[%s3851_s4 + $0x20] sm:$0xff]  ;;  %v197_v9 = vld [vmem:[%s3851_s4 + $0x28] sm:$0xff] }
   0x3   :  { %v3218_v7 = vpack.c.bf16 %v195_v6, %v194_v3  ;;  %v37_v10 = vld [vmem:[%s3852_s2] sm:$0xff]  ;;  %v38_v11 = vld [vmem:[%s3852_s2 + $0x8] sm:$0xff]  ;;  %v3238_v14 = vpack.c.bf16 %v197_v9, %v196_v8  ;;  %v198_v15 = vld [vmem:[%s3851_s4 + $0x30] sm:$0xff] }
   0x4   :  { %2679 = vmatpush3.bf16.msra.mxu1 %v3212_v5  ;;  %v2673_v12 = vpack.c.bf16 %v38_v11, %v37_v10  ;;  %v39_v13 = vld [vmem:[%s3853_s0] sm:$0xff]  ;;  %v199_v16 = vld [vmem:[%s3851_s4 + $0x38] sm:$0xff]  ;;  %v40_v17 = vld [vmem:[%s3853_s0 + $0x8] sm:$0xff] }
   0x5   :  { %2680 = vmatprep.subr.bf16.mxu1 %v3152_v0  ;;  %2022 = vmatprep.mubr.msk.f32.mxu0 %vm54_vm1, %v39_v13  ;;  %v3252_v18 = vpack.c.bf16 %v199_v16, %v198_v15  ;;  %v200_v19 = vld [vmem:[%s3851_s4 + $0x40] sm:$0xff]  ;;  %v201_v20 = vld [vmem:[%s3851_s4 + $0x48] sm:$0xff]  ;;  %v202_v22 = vld [vmem:[%s3851_s4 + $0x50] sm:$0xff] }
   0x6   :  { %2674 = vmatprep.subr.bf16.mxu0 %v2673_v12  ;;  %v3265_v21 = vpack.c.bf16 %v201_v20, %v200_v19  ;;  %v203_v23 = vld [vmem:[%s3851_s4 + $0x58] sm:$0xff]  ;;  %v204_v25 = vld [vmem:[%s3851_s4 + $0x60] sm:$0xff]  ;;  %v205_v26 = vld [vmem:[%s3851_s4 + $0x68] sm:$0xff] }
   0x7   :  { %2676 = vmatpush3.bf16.msra.mxu0 %v2673_v12  ;;  %v3277_v24 = vpack.c.bf16 %v203_v23, %v202_v22  ;;  %v3289_v27 = vpack.c.bf16 %v205_v26, %v204_v25  ;;  %v206_v28 = vld [vmem:[%s3851_s4 + $0x70] sm:$0xff]  ;;  %v207_v29 = vld [vmem:[%s3851_s4 + $0x78] sm:$0xff]  ;;  %v33_v31 = vld [vmem:[%s3854_s1] sm:$0xff] }
   0x8   :  { %2682 = vmatpush3.bf16.msra.mxu1 %v3218_v7  ;;  %2701 = vmatprep.subr.bf16.mxu0 %v3152_v0  ;;  %v3301_v30 = vpack.c.bf16 %v207_v29, %v206_v28  ;;  %v41_v32 = vld [vmem:[%s3853_s0 + $0x10] sm:$0xff]  ;;  %v42_v33 = vld [vmem:[%s3853_s0 + $0x18] sm:$0xff]  ;;  %v43_v34 = vld [vmem:[%s3853_s0 + $0x20] sm:$0xff] }
   0x9   :  { %2683 = vmatprep.subr.bf16.mxu1 %v3152_v0  ;;  %v44_v35 = vld [vmem:[%s3853_s0 + $0x28] sm:$0xff]  ;;  %v45_v36 = vld [vmem:[%s3853_s0 + $0x30] sm:$0xff]  ;;  %v46_v37 = vld [vmem:[%s3853_s0 + $0x38] sm:$0xff] }
   0xa   :  { %2023 = vmatmul.mubr.msk.f32.vlgmr.msra.gmra.mrb[0].mxu0 %vm54_vm1, %v40_v17  ;;  %v3364_v40 = vld [vmem:[%s3855_s5] ss:$0 sm:$0xff]  ;;  %v811_v17 = vld [vmem:[%s3856_s3 + $0x10] sm:$0xff]  ;;  %v814_v22 = vld [vmem:[%s3856_s3 + $0x28] sm:$0xff] }
   0xb   :  { %2703 = vmatpush3.bf16.msra.mxu0 %v3212_v5  ;;  %2025 = vmatprep.mubr.msk.f32.mxu0 %vm54_vm1, %v41_v32  ;;  %v816_v25 = vld [vmem:[%s3856_s3 + $0x38] sm:$0xff]  ;;  %v818_v28 = vld [vmem:[%s3856_s3 + $0x48] sm:$0xff] }
   0xc   :  { %2685 = vmatpush3.bf16.msra.mxu1 %v3238_v14  ;;  %2704 = vmatprep.subr.bf16.mxu0 %v3152_v0 }
   0xd   :  { %2686 = vmatprep.subr.bf16.mxu1 %v3152_v0 }
   0xe   :  { %2026 = vmatmul.mubr.msk.f32.gmra.mrb[2].mxu0 %vm54_vm1, %v42_v33  ;;  %v821_v33 = vld [vmem:[%s3856_s3 + $0x60] sm:$0xff] }
   0xf   :  { %2706 = vmatpush3.bf16.msra.mxu0 %v3218_v7  ;;  %2028 = vmatprep.mubr.msk.f32.mxu0 %vm54_vm1, %v43_v34  ;;  %v822_v34 = vld [vmem:[%s3856_s3 + $0x68] sm:$0xff] }
  0x10   :  { %2688 = vmatpush3.bf16.msra.mxu1 %v3252_v18  ;;  %2707 = vmatprep.subr.bf16.mxu0 %v3152_v0 }
  0x11   :  { %2689 = vmatprep.subr.bf16.mxu1 %v3152_v0 }
  0x12   :  { %2029 = vmatmul.mubr.msk.f32.gmra.mrb[4].mxu0 %vm54_vm1, %v44_v35  ;;  %v2893_v35 = vpack.c.bf16 %v822_v34, %v821_v33 }
  0x13   :  { %2709 = vmatpush3.bf16.msra.mxu0 %v3238_v14  ;;  %2031 = vmatprep.mubr.msk.f32.mxu0 %vm54_vm1, %v45_v36  ;;  %v823_v36 = vld [vmem:[%s3856_s3 + $0x70] sm:$0xff] }
  0x14   :  { %2691 = vmatpush3.bf16.msra.mxu1 %v3265_v21  ;;  %2710 = vmatprep.subr.bf16.mxu0 %v3152_v0 }
  0x15   :  { %2692 = vmatprep.subr.bf16.mxu1 %v3152_v0 }
  0x16   :  { %2032 = vmatmul.mubr.msk.f32.gmra.mrb[6].mxu0 %vm54_vm1, %v46_v37  ;;  %v824_v37 = vld [vmem:[%s3856_s3 + $0x78] sm:$0xff] }
  0x17   :  { %2712 = vmatpush3.bf16.msra.mxu0 %v3252_v18  ;;  %2101 = vmatprep.mubr.msk.f32.mxu0 %vm3153_vm0, %v3154_v4 }
  0x18   :  { %2694 = vmatpush3.bf16.msra.mxu1 %v3277_v24  ;;  %2713 = vmatprep.subr.bf16.mxu0 %v3152_v0 }
  0x19   :  { %2695 = vmatprep.subr.bf16.mxu1 %v3152_v0 }
  0x1b   :  { %2715 = vmatpush3.bf16.msra.mxu0 %v3265_v21 }
  0x1c   :  { %2697 = vmatpush3.bf16.msra.mxu1 %v3289_v27  ;;  %2716 = vmatprep.subr.bf16.mxu0 %v3152_v0 }
  0x1d   :  { %2698 = vmatprep.subr.bf16.mxu1 %v3152_v0 }
  0x1f   :  { %2718 = vmatpush3.bf16.msra.mxu0 %v3277_v24 }
  0x20   :  { %2700 = vmatpush3.bf16.msra.mxu1 %v3301_v30  ;;  %2719 = vmatprep.subr.bf16.mxu0 %v3152_v0 }
  0x21   :  { %2725 = vmatprep.subr.bf16.mxu1 %v3152_v0 }
  0x23   :  { %2067 = vmatmul.mubr.f32.vlgmr.msra.gmra.mrb[0].mxu1 %v33_v31  ;;  %2721 = vmatpush3.bf16.msra.mxu0 %v3289_v27  ;;  %v820_v31 = vld [vmem:[%s3856_s3 + $0x58] sm:$0xff] }
  0x24   :  { %2727 = vmatpush3.bf16.msra.mxu1 %v3212_v5  ;;  %2136 = vmatprep.mubr.msk.f32.mxu1 %vm3153_vm0, %v3154_v4 }
  0x25   :  { %2728 = vmatprep.subr.bf16.mxu1 %v3152_v0  ;;  %2722 = vmatprep.subr.bf16.mxu0 %v3152_v0 }
  0x27   :  { %2724 = vmatpush3.bf16.msra.mxu0 %v3301_v30 }
  0x28   :  { %2730 = vmatpush3.bf16.msra.mxu1 %v3218_v7  ;;  %2749 = vmatprep.subr.bf16.mxu0 %v3152_v0 }
  0x29   :  { %2731 = vmatprep.subr.bf16.mxu1 %v3152_v0 }
  0x2c   :  { %2733 = vmatpush3.bf16.msra.mxu1 %v3238_v14 }
  0x2d   :  { %2734 = vmatprep.subr.bf16.mxu1 %v3152_v0 }
  0x30   :  { %2736 = vmatpush3.bf16.msra.mxu1 %v3252_v18 }
  0x31   :  { %2737 = vmatprep.subr.bf16.mxu1 %v3152_v0 }
  0x34   :  { %2739 = vmatpush3.bf16.msra.mxu1 %v3265_v21 }
  0x35   :  { %2740 = vmatprep.subr.bf16.mxu1 %v3152_v0 }
  0x38   :  { %2742 = vmatpush3.bf16.msra.mxu1 %v3277_v24 }
  0x39   :  { %2743 = vmatprep.subr.bf16.mxu1 %v3152_v0 }
  0x3c   :  { %2745 = vmatpush3.bf16.msra.mxu1 %v3289_v27 }
  0x3d   :  { %2746 = vmatprep.subr.bf16.mxu1 %v3152_v0 }
  0x40   :  { %2748 = vmatpush3.bf16.msra.mxu1 %v3301_v30 }
  0x41   :  { %2773 = vmatprep.subr.bf16.mxu1 %v3152_v0 }
  0xdd   :  { %v2024_v38 = vpop.f32.mrb[0].mxu0 }
  0xde   :  { %v145_v39 = vpop.f32.mrb[1].mxu0  ;;  %v151_v52 = vadd.f32 %v2024_v38, %v3364_v40  ;;  %v2897_v38 = vpack.c.bf16 %v824_v37, %v823_v36 }
  0xdf   :  { %v146_v41 = vadd.f32 %v3364_v40, %v145_v39  ;;  %v1678_v39 = vld [vmem:[%s3851_s4 + $0x80] sm:$0xff] }
  0xe1   :  { %v2027_v46 = vpop.f32.mrb[2].mxu0 }
  0xe2   :  { %v155_v47 = vpop.f32.mrb[3].mxu0  ;;  %v161_v62 = vadd.f32 %v2027_v46, %v3364_v40  ;;  %v1682_v46 = vld [vmem:[%s3851_s4 + $0xa0] sm:$0xff] }
  0xe3   :  { %v156_v57 = vadd.f32 %v3364_v40, %v155_v47  ;;  %v1683_v47 = vld [vmem:[%s3851_s4 + $0xa8] sm:$0xff] }
  0xe5   :  { %v3388_v48 = vpop.f32.mrb[4].mxu0 }
  0xe6   :  { %v3390_v49 = vpop.f32.mrb[5].mxu0  ;;  %v171_v13 = vadd.f32 %v3388_v48, %v3364_v40  ;;  %v3566_v48 = vpack.c.bf16 %v1683_v47, %v1682_v46 }
  0xe7   :  { %v166_v6 = vadd.f32 %v3364_v40, %v3390_v49  ;;  %v1684_v49 = vld [vmem:[%s3851_s4 + $0xb0] sm:$0xff] }
  0xe9   :  { %v3392_v50 = vpop.f32.mrb[6].mxu0 }
  0xea   :  { %v3394_v51 = vpop.f32.mrb[7].mxu0 }
  0xf6   :  { %v276_v42 = vpop.f32.mrb[0].mxu1 }
  0xf7   :  { %v280_v43 = vadd.f32 %v276_v42, %v146_v41  ;;  %v2068_v44 = vpop.f32.mrb[1].mxu1  ;;  %v1679_v41 = vld [vmem:[%s3851_s4 + $0x88] sm:$0xff] }
  0xf8   :  { %v3546_v42 = vpack.c.bf16 %v1679_v41, %v1678_v39  ;;  %v1681_v44 = vld [vmem:[%s3851_s4 + $0x98] sm:$0xff] }
  0xf9   :  { %3120 = vtanh.f32 %v280_v43  ;;  %v1680_v43 = vld [vmem:[%s3851_s4 + $0x90] sm:$0xff] }
 0x103   :  { %v3367_v45 = vpop.eup %3120 }
 0x104   :  { %2102 = vmatmul.mubr.f32.vlgmr.msra.gmra.mrb[8].mxu0 %v3367_v45 }
 0x105   :  { %2751 = vmatpush3.bf16.msra.mxu0 %v3212_v5  ;;  %2171 = vmatprep.mubr.msk.f32.mxu0 %vm3153_vm0, %v3154_v4 }
 0x106   :  { %2752 = vmatprep.subr.bf16.mxu0 %v3152_v0 }
 0x109   :  { %2754 = vmatpush3.bf16.msra.mxu0 %v3218_v7 }
 0x10a   :  { %2755 = vmatprep.subr.bf16.mxu0 %v3152_v0 }
 0x10d   :  { %2757 = vmatpush3.bf16.msra.mxu0 %v3238_v14 }
 0x10e   :  { %2758 = vmatprep.subr.bf16.mxu0 %v3152_v0 }
 0x111   :  { %2760 = vmatpush3.bf16.msra.mxu0 %v3252_v18 }
 0x112   :  { %2761 = vmatprep.subr.bf16.mxu0 %v3152_v0 }
 0x115   :  { %2763 = vmatpush3.bf16.msra.mxu0 %v3265_v21 }
 0x116   :  { %2764 = vmatprep.subr.bf16.mxu0 %v3152_v0 }
 0x119   :  { %2766 = vmatpush3.bf16.msra.mxu0 %v3277_v24 }
 0x11a   :  { %2767 = vmatprep.subr.bf16.mxu0 %v3152_v0 }
 0x11d   :  { %2769 = vmatpush3.bf16.msra.mxu0 %v3289_v27 }
 0x11e   :  { %2770 = vmatprep.subr.bf16.mxu0 %v3152_v0 }
 0x121   :  { %2772 = vmatpush3.bf16.msra.mxu0 %v3301_v30 }
 0x122   :  { %2797 = vmatprep.subr.bf16.mxu0 %v3152_v0 }
 0x1d7   :  { %v351_v53 = vpop.f32.mrb[8].mxu0 }
 0x1d8   :  { %v355_v54 = vadd.f32 %v351_v53, %v151_v52  ;;  %v2103_v55 = vpop.f32.mrb[9].mxu0  ;;  %v1685_v52 = vld [vmem:[%s3851_s4 + $0xb8] sm:$0xff] }
 0x1d9   :  { %v3576_v53 = vpack.c.bf16 %v1685_v52, %v1684_v49  ;;  %v1687_v55 = vld [vmem:[%s3851_s4 + $0xc8] sm:$0xff] }
 0x1da   :  { %3122 = vtanh.f32 %v355_v54  ;;  %v1686_v54 = vld [vmem:[%s3851_s4 + $0xc0] sm:$0xff] }
 0x1e4   :  { %v3397_v56 = vpop.eup %3122 }
 0x1e5   :  { %2137 = vmatmul.mubr.f32.vlgmr.msra.gmra.mrb[2].mxu1 %v3397_v56 }
 0x1e6   :  { %2775 = vmatpush3.bf16.msra.mxu1 %v3212_v5  ;;  %2206 = vmatprep.mubr.msk.f32.mxu1 %vm3153_vm0, %v3154_v4 }
 0x1e7   :  { %2776 = vmatprep.subr.bf16.mxu1 %v3152_v0 }
 0x1ea   :  { %2778 = vmatpush3.bf16.msra.mxu1 %v3218_v7 }
 0x1eb   :  { %2779 = vmatprep.subr.bf16.mxu1 %v3152_v0 }
 0x1ee   :  { %2781 = vmatpush3.bf16.msra.mxu1 %v3238_v14 }
 0x1ef   :  { %2782 = vmatprep.subr.bf16.mxu1 %v3152_v0 }
 0x1f2   :  { %2784 = vmatpush3.bf16.msra.mxu1 %v3252_v18 }
 0x1f3   :  { %2785 = vmatprep.subr.bf16.mxu1 %v3152_v0 }
 0x1f6   :  { %2787 = vmatpush3.bf16.msra.mxu1 %v3265_v21 }
 0x1f7   :  { %2788 = vmatprep.subr.bf16.mxu1 %v3152_v0 }
 0x1fa   :  { %2790 = vmatpush3.bf16.msra.mxu1 %v3277_v24 }
 0x1fb   :  { %2791 = vmatprep.subr.bf16.mxu1 %v3152_v0 }
 0x1fe   :  { %2793 = vmatpush3.bf16.msra.mxu1 %v3289_v27 }
 0x1ff   :  { %2794 = vmatprep.subr.bf16.mxu1 %v3152_v0 }
 0x202   :  { %2796 = vmatpush3.bf16.msra.mxu1 %v3301_v30 }
 0x203   :  { %2821 = vmatprep.subr.bf16.mxu1 %v3152_v0 }
 0x2b8   :  { %v426_v58 = vpop.f32.mrb[2].mxu1 }
 0x2b9   :  { %v430_v59 = vadd.f32 %v426_v58, %v156_v57  ;;  %v2138_v60 = vpop.f32.mrb[3].mxu1  ;;  %v1688_v57 = vld [vmem:[%s3851_s4 + $0xd0] sm:$0xff]  ;;  %v1689_v58 = vld [vmem:[%s3851_s4 + $0xd8] sm:$0xff] }
 0x2ba   :  { %v1690_v60 = vld [vmem:[%s3851_s4 + $0xe0] sm:$0xff] }
 0x2bb   :  { %3124 = vtanh.f32 %v430_v59  ;;  %v3596_v59 = vpack.c.bf16 %v1689_v58, %v1688_v57  ;;  %v1572_v58 = vld [vmem:[%s3857_s6 + $0x18] sm:$0xff] }
 0x2c5   :  { %v3419_v61 = vpop.eup %3124 }
 0x2c6   :  { %2172 = vmatmul.mubr.f32.vlgmr.msra.gmra.mrb[10].mxu0 %v3419_v61 }
 0x2c7   :  { %2799 = vmatpush3.bf16.msra.mxu0 %v3212_v5  ;;  %2241 = vmatprep.mubr.msk.f32.mxu0 %vm3153_vm0, %v3154_v4 }
 0x2c8   :  { %2800 = vmatprep.subr.bf16.mxu0 %v3152_v0 }
 0x2cb   :  { %2802 = vmatpush3.bf16.msra.mxu0 %v3218_v7 }
 0x2cc   :  { %2803 = vmatprep.subr.bf16.mxu0 %v3152_v0 }
 0x2cf   :  { %2805 = vmatpush3.bf16.msra.mxu0 %v3238_v14 }
 0x2d0   :  { %2806 = vmatprep.subr.bf16.mxu0 %v3152_v0 }
 0x2d3   :  { %2808 = vmatpush3.bf16.msra.mxu0 %v3252_v18 }
 0x2d4   :  { %2809 = vmatprep.subr.bf16.mxu0 %v3152_v0 }
 0x2d7   :  { %2811 = vmatpush3.bf16.msra.mxu0 %v3265_v21 }
 0x2d8   :  { %2812 = vmatprep.subr.bf16.mxu0 %v3152_v0 }
 0x2db   :  { %2814 = vmatpush3.bf16.msra.mxu0 %v3277_v24 }
 0x2dc   :  { %2815 = vmatprep.subr.bf16.mxu0 %v3152_v0 }
 0x2df   :  { %2817 = vmatpush3.bf16.msra.mxu0 %v3289_v27 }
 0x2e0   :  { %2818 = vmatprep.subr.bf16.mxu0 %v3152_v0 }
 0x2e3   :  { %2820 = vmatpush3.bf16.msra.mxu0 %v3301_v30 }
 0x2e4   :  { %2845 = vmatprep.subr.bf16.mxu0 %v3152_v0 }
 0x399   :  { %v501_v63 = vpop.f32.mrb[10].mxu0 }
 0x39a   :  { %v505_v1 = vadd.f32 %v501_v63, %v161_v62  ;;  %v2173_v2 = vpop.f32.mrb[11].mxu0  ;;  %v1692_v63 = vld [vmem:[%s3851_s4 + $0xf0] sm:$0xff] }
 0x39c   :  { %3126 = vtanh.f32 %v505_v1  ;;  %v1693_v1 = vld [vmem:[%s3851_s4 + $0xf8] sm:$0xff] }
 0x39d   :  { %v3616_v2 = vpack.c.bf16 %v1693_v1, %v1692_v63  ;;  %v1576_v63 = vld [vmem:[%s3857_s6 + $0x38] sm:$0xff] }
 0x3a6   :  { %v3441_v3 = vpop.eup %3126 }
 0x3a7   :  { %2207 = vmatmul.mubr.f32.vlgmr.msra.gmra.mrb[4].mxu1 %v3441_v3 }
 0x3a8   :  { %2823 = vmatpush3.bf16.msra.mxu1 %v3212_v5  ;;  %2276 = vmatprep.mubr.msk.f32.mxu1 %vm3153_vm0, %v3154_v4 }
 0x3a9   :  { %2824 = vmatprep.subr.bf16.mxu1 %v3152_v0 }
 0x3ac   :  { %2826 = vmatpush3.bf16.msra.mxu1 %v3218_v7 }
 0x3ad   :  { %2827 = vmatprep.subr.bf16.mxu1 %v3152_v0 }
 0x3b0   :  { %2829 = vmatpush3.bf16.msra.mxu1 %v3238_v14 }
 0x3b1   :  { %2830 = vmatprep.subr.bf16.mxu1 %v3152_v0 }
 0x3b4   :  { %2832 = vmatpush3.bf16.msra.mxu1 %v3252_v18 }
 0x3b5   :  { %2833 = vmatprep.subr.bf16.mxu1 %v3152_v0 }
 0x3b8   :  { %2835 = vmatpush3.bf16.msra.mxu1 %v3265_v21 }
 0x3b9   :  { %2836 = vmatprep.subr.bf16.mxu1 %v3152_v0 }
 0x3bc   :  { %2838 = vmatpush3.bf16.msra.mxu1 %v3277_v24 }
 0x3bd   :  { %2839 = vmatprep.subr.bf16.mxu1 %v3152_v0 }
 0x3c0   :  { %2841 = vmatpush3.bf16.msra.mxu1 %v3289_v27 }
 0x3c1   :  { %2842 = vmatprep.subr.bf16.mxu1 %v3152_v0 }
 0x3c4   :  { %2844 = vmatpush3.bf16.msra.mxu1 %v3301_v30 }
 0x47a   :  { %v576_v8 = vpop.f32.mrb[4].mxu1 }
 0x47b   :  { %v580_v9 = vadd.f32 %v576_v8, %v166_v6  ;;  %v2208_v10 = vpop.f32.mrb[5].mxu1 }
 0x47d   :  { %3128 = vtanh.f32 %v580_v9 }
 0x487   :  { %v3463_v11 = vpop.eup %3128 }
 0x488   :  { %2242 = vmatmul.mubr.f32.vlgmr.msra.gmra.mrb[12].mxu0 %v3463_v11 }
 0x489   :  { %2847 = vmatpush3.bf16.msra.mxu0 %v3212_v5  ;;  %2311 = vmatprep.mubr.msk.f32.mxu0 %vm3153_vm0, %v3154_v4  ;;  %v809_v5 = vld [vmem:[%s3856_s3] sm:$0xff] }
 0x48a   :  { %2848 = vmatprep.subr.bf16.mxu0 %v3152_v0 }
 0x48d   :  { %2850 = vmatpush3.bf16.msra.mxu0 %v3218_v7  ;;  %v810_v7 = vld [vmem:[%s3856_s3 + $0x8] sm:$0xff] }
 0x48e   :  { %2851 = vmatprep.subr.bf16.mxu0 %v3152_v0  ;;  %v2869_v12 = vpack.c.bf16 %v810_v7, %v809_v5 }
 0x490   :  { %2870 = vmatprep.subr.bf16.mxu1 %v2869_v12 }
 0x491   :  { %2853 = vmatpush3.bf16.msra.mxu0 %v3238_v14 }
 0x492   :  { %2854 = vmatprep.subr.bf16.mxu0 %v3152_v0 }
 0x495   :  { %2856 = vmatpush3.bf16.msra.mxu0 %v3252_v18  ;;  %v812_v18 = vld [vmem:[%s3856_s3 + $0x18] sm:$0xff] }
 0x496   :  { %2857 = vmatprep.subr.bf16.mxu0 %v3152_v0  ;;  %v2873_v19 = vpack.c.bf16 %v812_v18, %v811_v17 }
 0x499   :  { %2859 = vmatpush3.bf16.msra.mxu0 %v3265_v21  ;;  %v813_v21 = vld [vmem:[%s3856_s3 + $0x20] sm:$0xff] }
 0x49a   :  { %2860 = vmatprep.subr.bf16.mxu0 %v3152_v0  ;;  %v2877_v23 = vpack.c.bf16 %v814_v22, %v813_v21 }
 0x49d   :  { %2862 = vmatpush3.bf16.msra.mxu0 %v3277_v24  ;;  %v815_v24 = vld [vmem:[%s3856_s3 + $0x30] sm:$0xff] }
 0x49e   :  { %2863 = vmatprep.subr.bf16.mxu0 %v3152_v0  ;;  %v2881_v26 = vpack.c.bf16 %v816_v25, %v815_v24 }
 0x4a1   :  { %2865 = vmatpush3.bf16.msra.mxu0 %v3289_v27  ;;  %v817_v27 = vld [vmem:[%s3856_s3 + $0x40] sm:$0xff] }
 0x4a2   :  { %2866 = vmatprep.subr.bf16.mxu0 %v3152_v0  ;;  %v2885_v29 = vpack.c.bf16 %v818_v28, %v817_v27 }
 0x4a5   :  { %2868 = vmatpush3.bf16.msra.mxu0 %v3301_v30  ;;  %v819_v30 = vld [vmem:[%s3856_s3 + $0x50] sm:$0xff] }
 0x4a6   :  { %2901 = vmatprep.subr.bf16.mxu0 %v3152_v0  ;;  %v2889_v32 = vpack.c.bf16 %v820_v31, %v819_v30 }
 0x55b   :  { %v651_v14 = vpop.f32.mrb[12].mxu0 }
 0x55c   :  { %v655_v15 = vadd.f32 %v651_v14, %v171_v13  ;;  %v2243_v16 = vpop.f32.mrb[13].mxu0  ;;  %v34_v14 = vld [vmem:[%s3854_s1 + $0x8] sm:$0xff] }
 0x55e   :  { %3130 = vtanh.f32 %v655_v15  ;;  %v181_v15 = vadd.f32 %v3392_v50, %v3364_v40 }
 0x568   :  { %v3131_v20 = vpop.eup %3130 }
 0x569   :  { %2277 = vmatmul.mubr.f32.vlgmr.msra.gmra.mrb[6].mxu1 %v3131_v20 }
 0x56a   :  { %2872 = vmatpush3.bf16.msra.mxu1 %v2869_v12  ;;  %2346 = vmatprep.mubr.f32.mxu1 %v3367_v45  ;;  %v3556_v45 = vpack.c.bf16 %v1681_v44, %v1680_v43 }
 0x56b   :  { %2874 = vmatprep.subr.bf16.mxu1 %v2873_v19 }
 0x56e   :  { %2876 = vmatpush3.bf16.msra.mxu1 %v2873_v19 }
 0x56f   :  { %2878 = vmatprep.subr.bf16.mxu1 %v2877_v23 }
 0x572   :  { %2880 = vmatpush3.bf16.msra.mxu1 %v2877_v23 }
 0x573   :  { %2882 = vmatprep.subr.bf16.mxu1 %v2881_v26 }
 0x576   :  { %2884 = vmatpush3.bf16.msra.mxu1 %v2881_v26 }
 0x577   :  { %2886 = vmatprep.subr.bf16.mxu1 %v2885_v29 }
 0x57a   :  { %2888 = vmatpush3.bf16.msra.mxu1 %v2885_v29 }
 0x57b   :  { %2890 = vmatprep.subr.bf16.mxu1 %v2889_v32 }
 0x57e   :  { %2892 = vmatpush3.bf16.msra.mxu1 %v2889_v32 }
 0x57f   :  { %2894 = vmatprep.subr.bf16.mxu1 %v2893_v35 }
 0x582   :  { %2896 = vmatpush3.bf16.msra.mxu1 %v2893_v35 }
 0x583   :  { %2898 = vmatprep.subr.bf16.mxu1 %v2897_v38 }
 0x586   :  { %2900 = vmatpush3.bf16.msra.mxu1 %v2897_v38 }
 0x587   :  { %2925 = vmatprep.subr.bf16.mxu1 %v3152_v0 }
 0x589   :  { %2347 = vmatmul.mubr.f32.vlgmr.msra.gmra.mrb[8].mxu1 %v3397_v56  ;;  %v3586_v56 = vpack.c.bf16 %v1687_v55, %v1686_v54  ;;  %v1569_v54 = vld [vmem:[%s3857_s6] sm:$0xff]  ;;  %v1570_v55 = vld [vmem:[%s3857_s6 + $0x8] sm:$0xff] }
 0x58a   :  { %2349 = vmatprep.mubr.f32.mxu1 %v3419_v61  ;;  %2927 = vmatpush3.bf16.msra.mxu1 %v3546_v42  ;;  %v1691_v61 = vld [vmem:[%s3851_s4 + $0xe8] sm:$0xff]  ;;  %v3094_v57 = vpack.c.bf16 %v1570_v55, %v1569_v54 }
 0x58b   :  { %2928 = vmatprep.subr.bf16.mxu1 %v3152_v0  ;;  %v3606_v62 = vpack.c.bf16 %v1691_v61, %v1690_v60  ;;  %v1574_v60 = vld [vmem:[%s3857_s6 + $0x28] sm:$0xff] }
 0x58d   :  { %2350 = vmatmul.mubr.f32.gmra.mrb[10].mxu1 %v3441_v3  ;;  %v176_v3 = vadd.f32 %v3364_v40, %v3394_v51 }
 0x58e   :  { %2352 = vmatprep.mubr.f32.mxu1 %v3463_v11  ;;  %2930 = vmatpush3.bf16.msra.mxu1 %v3556_v45 }
 0x58f   :  { %2931 = vmatprep.subr.bf16.mxu1 %v3152_v0 }
 0x591   :  { %2353 = vmatmul.mubr.f32.gmra.mrb[12].mxu1 %v3131_v20  ;;  %v3678_v20 = vld [vmem:[%s3855_s5 + $0x1] ss:$0 sm:$0xff] }
 0x592   :  { %2933 = vmatpush3.bf16.msra.mxu1 %v3566_v48 }
 0x593   :  { %2934 = vmatprep.subr.bf16.mxu1 %v3152_v0 }
 0x596   :  { %2936 = vmatpush3.bf16.msra.mxu1 %v3576_v53 }
 0x597   :  { %2937 = vmatprep.subr.bf16.mxu1 %v3152_v0 }
 0x59a   :  { %2939 = vmatpush3.bf16.msra.mxu1 %v3586_v56 }
 0x59b   :  { %2940 = vmatprep.subr.bf16.mxu1 %v3152_v0 }
 0x59e   :  { %2942 = vmatpush3.bf16.msra.mxu1 %v3596_v59 }
 0x59f   :  { %2943 = vmatprep.subr.bf16.mxu1 %v3152_v0 }
 0x5a2   :  { %2945 = vmatpush3.bf16.msra.mxu1 %v3606_v62 }
 0x5a3   :  { %2946 = vmatprep.subr.bf16.mxu1 %v3152_v0 }
 0x5a6   :  { %2948 = vmatpush3.bf16.msra.mxu1 %v3616_v2 }
 0x5a7   :  { %2973 = vmatprep.subr.bf16.mxu1 %v3152_v0 }
 0x63c   :  { %v726_v6 = vpop.f32.mrb[6].mxu1 }
 0x63d   :  { %v730_v8 = vadd.f32 %v726_v6, %v176_v3  ;;  %v2278_v9 = vpop.f32.mrb[7].mxu1  ;;  %v1578_v3 = vld [vmem:[%s3857_s6 + $0x48] sm:$0xff] }
 0x63f   :  { %3132 = vtanh.f32 %v730_v8 }
 0x649   :  { %v3133_v10 = vpop.eup %3132 }
 0x64a   :  { %2312 = vmatmul.mubr.f32.vlgmr.msra.gmra.mrb[14].mxu0 %v3133_v10  ;;  %2355 = vmatprep.mubr.f32.mxu1 %v3133_v10 }
 0x64b   :  { %2903 = vmatpush3.bf16.msra.mxu0 %v3546_v42  ;;  %2390 = vmatprep.mubr.msk.f32.mxu0 %vm3153_vm0, %v3154_v4 }
 0x64c   :  { %2904 = vmatprep.subr.bf16.mxu0 %v3152_v0 }
 0x64f   :  { %2906 = vmatpush3.bf16.msra.mxu0 %v3556_v45 }
 0x650   :  { %2907 = vmatprep.subr.bf16.mxu0 %v3152_v0 }
 0x653   :  { %2909 = vmatpush3.bf16.msra.mxu0 %v3566_v48 }
 0x654   :  { %2910 = vmatprep.subr.bf16.mxu0 %v3152_v0 }
 0x657   :  { %2912 = vmatpush3.bf16.msra.mxu0 %v3576_v53 }
 0x658   :  { %2913 = vmatprep.subr.bf16.mxu0 %v3152_v0 }
 0x65b   :  { %2915 = vmatpush3.bf16.msra.mxu0 %v3586_v56 }
 0x65c   :  { %v3633_v51 = vpop.f32.mrb[8].mxu1  ;;  %2916 = vmatprep.subr.bf16.mxu0 %v3152_v0 }
 0x65d   :  { %v907_v11 = vpop.f32.mrb[9].mxu1  ;;  %v913_v26 = vadd.f32 %v3633_v51, %v3678_v20 }
 0x65e   :  { %v908_v21 = vadd.f32 %v3678_v20, %v907_v11 }
 0x65f   :  { %2918 = vmatpush3.bf16.msra.mxu0 %v3596_v59 }
 0x660   :  { %v3637_v5 = vpop.f32.mrb[10].mxu1  ;;  %2919 = vmatprep.subr.bf16.mxu0 %v3152_v0 }
 0x661   :  { %v3640_v7 = vpop.f32.mrb[11].mxu1  ;;  %v923_v36 = vadd.f32 %v3637_v5, %v3678_v20  ;;  %v1579_v5 = vld [vmem:[%s3857_s6 + $0x50] sm:$0xff] }
 0x662   :  { %v918_v31 = vadd.f32 %v3678_v20, %v3640_v7  ;;  %v1580_v7 = vld [vmem:[%s3857_s6 + $0x58] sm:$0xff] }
 0x663   :  { %2921 = vmatpush3.bf16.msra.mxu0 %v3606_v62 }
 0x664   :  { %v3643_v12 = vpop.f32.mrb[12].mxu1  ;;  %2922 = vmatprep.subr.bf16.mxu0 %v3152_v0 }
 0x665   :  { %v3646_v13 = vpop.f32.mrb[13].mxu1 }
 0x666   :  { %v928_v43 = vadd.f32 %v3678_v20, %v3646_v13  ;;  %v1581_v13 = vld [vmem:[%s3857_s6 + $0x60] sm:$0xff] }
 0x667   :  { %2924 = vmatpush3.bf16.msra.mxu0 %v3616_v2 }
 0x668   :  { %2949 = vmatprep.subr.bf16.mxu0 %v3152_v0 }
 0x66a   :  { %2391 = vmatmul.mubr.f32.vlgmr.msra.gmra.mrb[16].mxu0 %v34_v14  ;;  %v1582_v14 = vld [vmem:[%s3857_s6 + $0x68] sm:$0xff] }
 0x66b   :  { %2951 = vmatpush3.bf16.msra.mxu0 %v3546_v42  ;;  %2460 = vmatprep.mubr.msk.f32.mxu0 %vm3153_vm0, %v3154_v4 }
 0x66c   :  { %2952 = vmatprep.subr.bf16.mxu0 %v3152_v0 }
 0x66f   :  { %2954 = vmatpush3.bf16.msra.mxu0 %v3556_v45 }
 0x670   :  { %2955 = vmatprep.subr.bf16.mxu0 %v3152_v0 }
 0x673   :  { %2957 = vmatpush3.bf16.msra.mxu0 %v3566_v48 }
 0x674   :  { %2958 = vmatprep.subr.bf16.mxu0 %v3152_v0 }
 0x677   :  { %2960 = vmatpush3.bf16.msra.mxu0 %v3576_v53 }
 0x678   :  { %2961 = vmatprep.subr.bf16.mxu0 %v3152_v0 }
 0x67b   :  { %2963 = vmatpush3.bf16.msra.mxu0 %v3586_v56 }
 0x67c   :  { %2964 = vmatprep.subr.bf16.mxu0 %v3152_v0 }
 0x67f   :  { %2966 = vmatpush3.bf16.msra.mxu0 %v3596_v59 }
 0x680   :  { %2967 = vmatprep.subr.bf16.mxu0 %v3152_v0 }
 0x683   :  { %2969 = vmatpush3.bf16.msra.mxu0 %v3606_v62 }
 0x684   :  { %2970 = vmatprep.subr.bf16.mxu0 %v3152_v0 }
 0x687   :  { %2972 = vmatpush3.bf16.msra.mxu0 %v3616_v2 }
 0x688   :  { %2997 = vmatprep.subr.bf16.mxu0 %v3152_v0 }
 0x71d   :  { %v801_v16 = vpop.f32.mrb[14].mxu0 }
 0x71e   :  { %v805_v17 = vadd.f32 %v801_v16, %v181_v15  ;;  %v2313_v18 = vpop.f32.mrb[15].mxu0  ;;  %v3112_v15 = vpack.c.bf16 %v1582_v14, %v1581_v13  ;;  %v1583_v16 = vld [vmem:[%s3857_s6 + $0x70] sm:$0xff] }
 0x720   :  { %3134 = vtanh.f32 %v805_v17  ;;  %v1584_v17 = vld [vmem:[%s3857_s6 + $0x78] sm:$0xff] }
 0x721   :  { %v3115_v18 = vpack.c.bf16 %v1584_v17, %v1583_v16 }
 0x72a   :  { %v3135_v19 = vpop.eup %3134 }
 0x72b   :  { %2356 = vmatmul.mubr.f32.gmra.mrb[14].mxu1 %v3135_v19 }
 0x72c   :  { %2425 = vmatprep.mubr.msk.f32.mxu1 %vm3153_vm0, %v3154_v4 }
 0x73d   :  { %v1040_v22 = vpop.f32.mrb[16].mxu0 }
 0x73e   :  { %v1044_v23 = vadd.f32 %v1040_v22, %v908_v21  ;;  %v2392_v24 = vpop.f32.mrb[17].mxu0 }
 0x740   :  { %3136 = vtanh.f32 %v1044_v23 }
 0x74a   :  { %v3137_v40 = vpop.eup %3136 }
 0x74b   :  { %2426 = vmatmul.mubr.f32.vlgmr.msra.gmra.mrb[16].mxu1 %v3137_v40  ;;  %v1694_v40 = vld [vmem:[%s3858_s7] ss:$0 sm:$0xff] }
 0x74c   :  { %2975 = vmatpush3.bf16.msra.mxu1 %v3546_v42  ;;  %2495 = vmatprep.mubr.msk.f32.mxu1 %vm3153_vm0, %v3154_v4 }
 0x74d   :  { %2976 = vmatprep.subr.bf16.mxu1 %v3152_v0 }
 0x750   :  { %2978 = vmatpush3.bf16.msra.mxu1 %v3556_v45 }
 0x751   :  { %2979 = vmatprep.subr.bf16.mxu1 %v3152_v0 }
 0x754   :  { %2981 = vmatpush3.bf16.msra.mxu1 %v3566_v48 }
 0x755   :  { %2982 = vmatprep.subr.bf16.mxu1 %v3152_v0 }
 0x758   :  { %2984 = vmatpush3.bf16.msra.mxu1 %v3576_v53 }
 0x759   :  { %2985 = vmatprep.subr.bf16.mxu1 %v3152_v0 }
 0x75c   :  { %2987 = vmatpush3.bf16.msra.mxu1 %v3586_v56 }
 0x75d   :  { %2988 = vmatprep.subr.bf16.mxu1 %v3152_v0 }
 0x760   :  { %2990 = vmatpush3.bf16.msra.mxu1 %v3596_v59 }
 0x761   :  { %2991 = vmatprep.subr.bf16.mxu1 %v3152_v0 }
 0x764   :  { %2993 = vmatpush3.bf16.msra.mxu1 %v3606_v62 }
 0x765   :  { %2994 = vmatprep.subr.bf16.mxu1 %v3152_v0 }
 0x768   :  { %2996 = vmatpush3.bf16.msra.mxu1 %v3616_v2 }
 0x769   :  { %3021 = vmatprep.subr.bf16.mxu1 %v3152_v0 }
 0x7fe   :  { %v3699_v50 = vpop.f32.mrb[14].mxu1 }
 0x7ff   :  { %v3701_v25 = vpop.f32.mrb[15].mxu1  ;;  %v943_v19 = vadd.f32 %v3699_v50, %v3678_v20 }
 0x800   :  { %v938_v8 = vadd.f32 %v3678_v20, %v3701_v25 }
 0x81e   :  { %v1114_v27 = vpop.f32.mrb[16].mxu1 }
 0x81f   :  { %v1118_v28 = vadd.f32 %v1114_v27, %v913_v26  ;;  %v2427_v29 = vpop.f32.mrb[17].mxu1 }
 0x821   :  { %3138 = vtanh.f32 %v1118_v28 }
 0x82b   :  { %v3139_v30 = vpop.eup %3138 }
 0x82c   :  { %2461 = vmatmul.mubr.f32.vlgmr.msra.gmra.mrb[18].mxu0 %v3139_v30 }
 0x82d   :  { %2999 = vmatpush3.bf16.msra.mxu0 %v3546_v42  ;;  %2530 = vmatprep.mubr.msk.f32.mxu0 %vm3153_vm0, %v3154_v4 }
 0x82e   :  { %3000 = vmatprep.subr.bf16.mxu0 %v3152_v0 }
 0x831   :  { %3002 = vmatpush3.bf16.msra.mxu0 %v3556_v45 }
 0x832   :  { %3003 = vmatprep.subr.bf16.mxu0 %v3152_v0 }
 0x835   :  { %3005 = vmatpush3.bf16.msra.mxu0 %v3566_v48 }
 0x836   :  { %3006 = vmatprep.subr.bf16.mxu0 %v3152_v0 }
 0x839   :  { %3008 = vmatpush3.bf16.msra.mxu0 %v3576_v53 }
 0x83a   :  { %3009 = vmatprep.subr.bf16.mxu0 %v3152_v0 }
 0x83d   :  { %3011 = vmatpush3.bf16.msra.mxu0 %v3586_v56 }
 0x83e   :  { %3012 = vmatprep.subr.bf16.mxu0 %v3152_v0 }
 0x841   :  { %3014 = vmatpush3.bf16.msra.mxu0 %v3596_v59 }
 0x842   :  { %3015 = vmatprep.subr.bf16.mxu0 %v3152_v0 }
 0x845   :  { %3017 = vmatpush3.bf16.msra.mxu0 %v3606_v62 }
 0x846   :  { %3018 = vmatprep.subr.bf16.mxu0 %v3152_v0 }
 0x849   :  { %3020 = vmatpush3.bf16.msra.mxu0 %v3616_v2 }
 0x84a   :  { %3045 = vmatprep.subr.bf16.mxu0 %v3152_v0 }
 0x8ff   :  { %v1188_v32 = vpop.f32.mrb[18].mxu0 }
 0x900   :  { %v1192_v33 = vadd.f32 %v1188_v32, %v918_v31  ;;  %v2462_v34 = vpop.f32.mrb[19].mxu0 }
 0x902   :  { %3140 = vtanh.f32 %v1192_v33 }
 0x90c   :  { %v3141_v35 = vpop.eup %3140 }
 0x90d   :  { %2496 = vmatmul.mubr.f32.vlgmr.msra.gmra.mrb[18].mxu1 %v3141_v35 }
 0x90e   :  { %3023 = vmatpush3.bf16.msra.mxu1 %v3546_v42  ;;  %2565 = vmatprep.mubr.msk.f32.mxu1 %vm3153_vm0, %v3154_v4 }
 0x90f   :  { %3024 = vmatprep.subr.bf16.mxu1 %v3152_v0 }
 0x912   :  { %3026 = vmatpush3.bf16.msra.mxu1 %v3556_v45 }
 0x913   :  { %3027 = vmatprep.subr.bf16.mxu1 %v3152_v0 }
 0x916   :  { %3029 = vmatpush3.bf16.msra.mxu1 %v3566_v48 }
 0x917   :  { %3030 = vmatprep.subr.bf16.mxu1 %v3152_v0 }
 0x91a   :  { %3032 = vmatpush3.bf16.msra.mxu1 %v3576_v53 }
 0x91b   :  { %3033 = vmatprep.subr.bf16.mxu1 %v3152_v0 }
 0x91e   :  { %3035 = vmatpush3.bf16.msra.mxu1 %v3586_v56 }
 0x91f   :  { %3036 = vmatprep.subr.bf16.mxu1 %v3152_v0 }
 0x922   :  { %3038 = vmatpush3.bf16.msra.mxu1 %v3596_v59 }
 0x923   :  { %3039 = vmatprep.subr.bf16.mxu1 %v3152_v0 }
 0x926   :  { %3041 = vmatpush3.bf16.msra.mxu1 %v3606_v62 }
 0x927   :  { %3042 = vmatprep.subr.bf16.mxu1 %v3152_v0 }
 0x92a   :  { %3044 = vmatpush3.bf16.msra.mxu1 %v3616_v2 }
 0x92b   :  { %3069 = vmatprep.subr.bf16.mxu1 %v3152_v0 }
 0x9e0   :  { %v1262_v37 = vpop.f32.mrb[18].mxu1 }
 0x9e1   :  { %v1266_v38 = vadd.f32 %v1262_v37, %v923_v36  ;;  %v2497_v39 = vpop.f32.mrb[19].mxu1 }
 0x9e3   :  { %3142 = vtanh.f32 %v1266_v38 }
 0x9ed   :  { %v3143_v41 = vpop.eup %3142 }
 0x9ee   :  { %2531 = vmatmul.mubr.f32.vlgmr.msra.gmra.mrb[20].mxu0 %v3143_v41 }
 0x9ef   :  { %3047 = vmatpush3.bf16.msra.mxu0 %v3546_v42  ;;  %2600 = vmatprep.mubr.msk.f32.mxu0 %vm3153_vm0, %v3154_v4 }
 0x9f0   :  { %3048 = vmatprep.subr.bf16.mxu0 %v3152_v0 }
 0x9f3   :  { %3050 = vmatpush3.bf16.msra.mxu0 %v3556_v45 }
 0x9f4   :  { %3051 = vmatprep.subr.bf16.mxu0 %v3152_v0 }
 0x9f7   :  { %3053 = vmatpush3.bf16.msra.mxu0 %v3566_v48 }
 0x9f8   :  { %3054 = vmatprep.subr.bf16.mxu0 %v3152_v0 }
 0x9fb   :  { %3056 = vmatpush3.bf16.msra.mxu0 %v3576_v53 }
 0x9fc   :  { %3057 = vmatprep.subr.bf16.mxu0 %v3152_v0 }
 0x9ff   :  { %3059 = vmatpush3.bf16.msra.mxu0 %v3586_v56 }
 0xa00   :  { %3060 = vmatprep.subr.bf16.mxu0 %v3152_v0 }
 0xa03   :  { %3062 = vmatpush3.bf16.msra.mxu0 %v3596_v59 }
 0xa04   :  { %3063 = vmatprep.subr.bf16.mxu0 %v3152_v0 }
 0xa07   :  { %3065 = vmatpush3.bf16.msra.mxu0 %v3606_v62 }
 0xa08   :  { %3066 = vmatprep.subr.bf16.mxu0 %v3152_v0 }
 0xa0b   :  { %3068 = vmatpush3.bf16.msra.mxu0 %v3616_v2 }
 0xa0c   :  { %3093 = vmatprep.subr.bf16.mxu0 %v3152_v0 }
 0xac1   :  { %v1336_v44 = vpop.f32.mrb[20].mxu0 }
 0xac2   :  { %v1340_v46 = vadd.f32 %v1336_v44, %v928_v43  ;;  %v2532_v47 = vpop.f32.mrb[21].mxu0 }
 0xac4   :  { %3144 = vtanh.f32 %v1340_v46 }
 0xace   :  { %v3145_v49 = vpop.eup %3144 }
 0xacf   :  { %2566 = vmatmul.mubr.f32.vlgmr.msra.gmra.mrb[20].mxu1 %v3145_v49 }
 0xad0   :  { %3071 = vmatpush3.bf16.msra.mxu1 %v3546_v42  ;;  %2635 = vmatprep.mubr.msk.f32.mxu1 %vm3153_vm0, %v3154_v4  ;;  %v933_v42 = vadd.f32 %v3643_v12, %v3678_v20  ;;  %v3109_v12 = vpack.c.bf16 %v1580_v7, %v1579_v5 }
 0xad1   :  { %3072 = vmatprep.subr.bf16.mxu1 %v3152_v0 }
 0xad4   :  { %3074 = vmatpush3.bf16.msra.mxu1 %v3556_v45 }
 0xad5   :  { %3075 = vmatprep.subr.bf16.mxu1 %v3152_v0 }
 0xad8   :  { %3077 = vmatpush3.bf16.msra.mxu1 %v3566_v48 }
 0xad9   :  { %3078 = vmatprep.subr.bf16.mxu1 %v3152_v0 }
 0xadc   :  { %3080 = vmatpush3.bf16.msra.mxu1 %v3576_v53 }
 0xadd   :  { %3081 = vmatprep.subr.bf16.mxu1 %v3152_v0 }
 0xae0   :  { %3083 = vmatpush3.bf16.msra.mxu1 %v3586_v56  ;;  %v1571_v56 = vld [vmem:[%s3857_s6 + $0x10] sm:$0xff] }
 0xae1   :  { %3084 = vmatprep.subr.bf16.mxu1 %v3152_v0 }
 0xae4   :  { %3086 = vmatpush3.bf16.msra.mxu1 %v3596_v59  ;;  %v3097_v59 = vpack.c.bf16 %v1572_v58, %v1571_v56 }
 0xae5   :  { %3087 = vmatprep.subr.bf16.mxu1 %v3152_v0 }
 0xae8   :  { %3089 = vmatpush3.bf16.msra.mxu1 %v3606_v62  ;;  %v1575_v62 = vld [vmem:[%s3857_s6 + $0x30] sm:$0xff] }
 0xae9   :  { %3090 = vmatprep.subr.bf16.mxu1 %v3152_v0  ;;  %v3103_v1 = vpack.c.bf16 %v1576_v63, %v1575_v62 }
 0xaec   :  { %3092 = vmatpush3.bf16.msra.mxu1 %v3616_v2  ;;  %v1577_v2 = vld [vmem:[%s3857_s6 + $0x40] sm:$0xff] }
 0xaed   :  { %v3106_v6 = vpack.c.bf16 %v1578_v3, %v1577_v2 }
 0xba2   :  { %v1410_v45 = vpop.f32.mrb[20].mxu1 }
 0xba3   :  { %v1414_v48 = vadd.f32 %v1410_v45, %v933_v42  ;;  %v2567_v52 = vpop.f32.mrb[21].mxu1 }
 0xba5   :  { %3146 = vtanh.f32 %v1414_v48 }
 0xbaf   :  { %v3147_v53 = vpop.eup %3146 }
 0xbb0   :  { %2601 = vmatmul.mubr.f32.vlgmr.msra.gmra.mrb[22].mxu0 %v3147_v53 }
 0xbb1   :  { %2670 = vmatprep.mubr.msk.f32.mxu0 %vm3153_vm0, %v3154_v4  ;;  %3095 = vmatpush3.bf16.msra.mxu0 %v3094_v57  ;;  %v1573_v4 = vld [vmem:[%s3857_s6 + $0x20] sm:$0xff] }
 0xbb2   :  { %3096 = vmatprep.subr.bf16.mxu0 %v3152_v0  ;;  %v3100_v61 = vpack.c.bf16 %v1574_v60, %v1573_v4 }
 0xbb5   :  { %3098 = vmatpush3.bf16.msra.mxu0 %v3097_v59 }
 0xbb6   :  { %3099 = vmatprep.subr.bf16.mxu0 %v3152_v0 }
 0xbb9   :  { %3101 = vmatpush3.bf16.msra.mxu0 %v3100_v61 }
 0xbba   :  { %3102 = vmatprep.subr.bf16.mxu0 %v3152_v0 }
 0xbbd   :  { %3104 = vmatpush3.bf16.msra.mxu0 %v3103_v1 }
 0xbbe   :  { %3105 = vmatprep.subr.bf16.mxu0 %v3152_v0 }
 0xbc1   :  { %3107 = vmatpush3.bf16.msra.mxu0 %v3106_v6 }
 0xbc2   :  { %3108 = vmatprep.subr.bf16.mxu0 %v3152_v0 }
 0xbc5   :  { %3110 = vmatpush3.bf16.msra.mxu0 %v3109_v12 }
 0xbc6   :  { %3111 = vmatprep.subr.bf16.mxu0 %v3152_v0 }
 0xbc9   :  { %3113 = vmatpush3.bf16.msra.mxu0 %v3112_v15 }
 0xbca   :  { %3114 = vmatprep.subr.bf16.mxu0 %v3152_v0 }
 0xbcd   :  { %3116 = vmatpush3.bf16.msra.mxu0 %v3115_v18 }
 0xc83   :  { %v1484_v9 = vpop.f32.mrb[22].mxu0 }
 0xc84   :  { %v1488_v10 = vadd.f32 %v1484_v9, %v938_v8  ;;  %v2602_v51 = vpop.f32.mrb[23].mxu0 }
 0xc86   :  { %3148 = vtanh.f32 %v1488_v10 }
 0xc90   :  { %v3149_v11 = vpop.eup %3148 }
 0xc91   :  { %2636 = vmatmul.mubr.f32.vlgmr.msra.gmra.mrb[22].mxu1 %v3149_v11 }
 0xd64   :  { %v1558_v21 = vpop.f32.mrb[22].mxu1 }
 0xd65   :  { %v1562_v22 = vadd.f32 %v1558_v21, %v943_v19  ;;  %v2637_v23 = vpop.f32.mrb[23].mxu1 }
 0xd67   :  { %3150 = vtanh.f32 %v1562_v22 }
 0xd71   :  { %v3151_v24 = vpop.eup %3150 }
 0xd72   :  { %2671 = vmatmul.mubr.f32.vlgmr.msra.gmra.mrb[24].mxu0 %v3151_v24 }
 0xe45   :  { %v1658_v25 = vpop.f32.mrb[24].mxu0 }
 0xe46   :  { %v1659_v26 = vadd.f32 %v1694_v40, %v1658_v25  ;;  %v2672_v27 = vpop.f32.mrb[25].mxu0 }
 0xe48   :  { %1662 = vst [vmem:[%s3859_s8] sm:$0xff] %v1659_v26 }

</bundles_post_ra>
